<compile_context>
chip_gen: v7x
topology: tpu7x:2x2x1
jax: 0.10.0
libtpu: 0.0.40
codegen_flags: <defaults>
</compile_context>

<pallas_src>
import jax
import jax.numpy as jnp
from jax.experimental import pallas as pl
from jax.experimental.pallas import tpu as pltpu

DIMS = (784, 512, 256, 128, 64, 10)     # logical PyTorch layer widths


def _mlp_kernel(x_ref,
                w1_ref, b1_ref,
                w2_ref, b2_ref,
                w3_ref, b3_ref,
                w4_ref, b4_ref,
                w5_ref, b5_ref,
                o_ref):
    """Fused forward: 3x(Linear+ReLU), Linear+Sigmoid, Linear.

    bf16 MXU inputs, f32 accumulation; activations kept bf16 between layers.
    """
    x = x_ref[...].astype(jnp.bfloat16)                               # (TB, 784)

    h = jnp.dot(x, w1_ref[...], preferred_element_type=jnp.float32) + b1_ref[...]
    h = jnp.maximum(h, 0.0).astype(jnp.bfloat16)                      # (TB, 512)

    h = jnp.dot(h, w2_ref[...], preferred_element_type=jnp.float32) + b2_ref[...]
    h = jnp.maximum(h, 0.0).astype(jnp.bfloat16)                      # (TB, 256)

    h = jnp.dot(h, w3_ref[...], preferred_element_type=jnp.float32) + b3_ref[...]
    h = jnp.maximum(h, 0.0).astype(jnp.bfloat16)                      # (TB, 128)

    h = jnp.dot(h, w4_ref[...], preferred_element_type=jnp.float32) + b4_ref[...]
    # sigmoid(x) == 0.5 * tanh(0.5 * x) + 0.5  -> single EUP op (vtanh).
    h = (0.5 * jnp.tanh(0.5 * h) + 0.5).astype(jnp.bfloat16)          # (TB, 64)

    o_ref[...] = (jnp.dot(h, w5_ref[...], preferred_element_type=jnp.float32)
                  + b5_ref[...]).astype(o_ref.dtype)                  # (TB, 10)


def _prep_params(params):
    """(W:(in,out) f32, b:(out,) f32) -> (W bf16 (in,out), b f32 (1,out))."""
    return [(w.astype(jnp.bfloat16), b.reshape(1, -1).astype(jnp.float32))
            for w, b in params]


def _pick_batch_tiling(B):
    """Pad batch to a multiple of 128 and pick the batch tile TB.

    Big tiles amortize per-step overhead (v6e/v7x); keep >=2 grid steps when
    the batch allows so the 'parallel' grid axis can use both v7x TCs.
    """
    b_pad = pl.cdiv(max(B, 1), 128) * 128
    if b_pad >= 1024 and b_pad % 512 == 0:
        tb = 512
    elif b_pad >= 512 and b_pad % 256 == 0:
        tb = 256
    else:
        tb = 128
    return b_pad, tb


@jax.jit
def net_forward(x, params):
    """x: anything flattening to (-1, 784). params: list of (W:(in,out) f32, b:(out,) f32)."""
    x2d = x.reshape(-1, DIMS[0]).astype(jnp.float32)          # == torch x.view(-1, 784)
    B = x2d.shape[0]
    b_pad, TB = _pick_batch_tiling(B)
    if b_pad != B:                                            # only pad the remainder rows
        x2d = jnp.pad(x2d, ((0, b_pad - B), (0, 0)))

    prepped = _prep_params(params)
    flat_args = [x2d]
    for w, b in prepped:
        flat_args += [w, b]

    x_spec = pl.BlockSpec((TB, DIMS[0]), lambda i: (i, 0))
    out_spec = pl.BlockSpec((TB, DIMS[-1]), lambda i: (i, 0))
    # Weights/biases: full-array blocks, constant index map -> fetched once, resident.
    param_specs = []
    for w, b in prepped:
        param_specs.append(pl.BlockSpec(w.shape, lambda i: (0, 0)))
        param_specs.append(pl.BlockSpec(b.shape, lambda i: (0, 0)))

    flops = 2 * b_pad * sum(DIMS[i] * DIMS[i + 1] for i in range(5))
    bytes_accessed = (b_pad * DIMS[0] * 4
                      + sum(w.size * 2 + b.size * 4 for w, b in prepped)
                      + b_pad * DIMS[-1] * 4)

    out = pl.pallas_call(
        _mlp_kernel,
        out_shape=jax.ShapeDtypeStruct((b_pad, DIMS[-1]), jnp.float32),
        grid=(b_pad // TB,),
        in_specs=[x_spec] + param_specs,
        out_specs=out_spec,
        compiler_params=pltpu.CompilerParams(
            dimension_semantics=("parallel",),
            vmem_limit_bytes=32 << 20,
        ),
        cost_estimate=pl.CostEstimate(
            flops=flops,
            transcendentals=b_pad * DIMS[4],
            bytes_accessed=bytes_accessed,
        ),
    )(*flat_args)

    return out[:B]                                            # real (B, 10) logits


def init_params(key):
    """Mirror torch.nn.Linear default init U[-1/sqrt(in), 1/sqrt(in)].

    Weights stored TRANSPOSED relative to PyTorch: shape (in, out), f32.
    """
    params = []
    for i in range(len(DIMS) - 1):
        fan_in, fan_out = DIMS[i], DIMS[i + 1]
        key, kw, kb = jax.random.split(key, 3)
        bound = 1.0 / jnp.sqrt(float(fan_in))
        w = jax.random.uniform(kw, (fan_in, fan_out), jnp.float32, -bound, bound)
        b = jax.random.uniform(kb, (fan_out,), jnp.float32, -bound, bound)
        params.append((w, b))
    return params


def reference_forward(x, params):
    """Plain-JAX reference mimicking the kernel's bf16-input / f32-accum precision."""
    h = x.reshape(-1, DIMS[0]).astype(jnp.float32)
    for i, (w, b) in enumerate(params):
        w_bf = w.astype(jnp.bfloat16).astype(jnp.float32)
        h_bf = h.astype(jnp.bfloat16).astype(jnp.float32)
        h = h_bf @ w_bf + b[None, :]
        if i < 3:
            h = jnp.maximum(h, 0.0)
        elif i == 3:
            h = jax.nn.sigmoid(h)
    return h


if __name__ == "__main__":
    key = jax.random.PRNGKey(0)
    key, kx = jax.random.split(key)

    # Small MNIST-like batch: NCHW (B=2, C=1, H=28, W=28); flattens to (2, 784).
    x = jax.random.normal(kx, (2, 1, 28, 28), jnp.float32)
    params = init_params(key)

    out = jax.block_until_ready(net_forward(x, params))
    ref = reference_forward(x, params)

    assert out.shape == (2, 10), out.shape
    assert jnp.allclose(out, ref, atol=2e-2, rtol=2e-2), (
        "mismatch vs reference", jnp.max(jnp.abs(out - ref)))

    print("KERNEL_OK")
</pallas_src>

<mosaic_0001>
module attributes {stable_mosaic.version = 11 : i64} {
  func.func @_mlp_kernel(%arg0: i32, %arg1: memref<128x784xf32, #tpu.memory_space<vmem>>, %arg2: memref<784x512xbf16, #tpu.memory_space<vmem>>, %arg3: memref<1x512xf32, #tpu.memory_space<vmem>>, %arg4: memref<512x256xbf16, #tpu.memory_space<vmem>>, %arg5: memref<1x256xf32, #tpu.memory_space<vmem>>, %arg6: memref<256x128xbf16, #tpu.memory_space<vmem>>, %arg7: memref<1x128xf32, #tpu.memory_space<vmem>>, %arg8: memref<128x64xbf16, #tpu.memory_space<vmem>>, %arg9: memref<1x64xf32, #tpu.memory_space<vmem>>, %arg10: memref<64x10xbf16, #tpu.memory_space<vmem>>, %arg11: memref<1x10xf32, #tpu.memory_space<vmem>>, %arg12: memref<128x10xf32, #tpu.memory_space<vmem>>) attributes {dimension_semantics = [#tpu.dimension_semantics<parallel>], iteration_bounds = array<i64: 1>, scalar_prefetch = 0 : i64, scratch_operands = 0 : i64, tpu.core_type = #tpu.core_type<tc>, window_params = [{transform_indices = @transform_0, window_bounds = array<i64: 128, 784>}, {pipeline_mode = #tpu.pipeline_mode<synchronous>, transform_indices = @transform_1, window_bounds = array<i64: 784, 512>}, {pipeline_mode = #tpu.pipeline_mode<synchronous>, transform_indices = @transform_2, window_bounds = array<i64: 1, 512>}, {pipeline_mode = #tpu.pipeline_mode<synchronous>, transform_indices = @transform_3, window_bounds = array<i64: 512, 256>}, {pipeline_mode = #tpu.pipeline_mode<synchronous>, transform_indices = @transform_4, window_bounds = array<i64: 1, 256>}, {pipeline_mode = #tpu.pipeline_mode<synchronous>, transform_indices = @transform_5, window_bounds = array<i64: 256, 128>}, {pipeline_mode = #tpu.pipeline_mode<synchronous>, transform_indices = @transform_6, window_bounds = array<i64: 1, 128>}, {pipeline_mode = #tpu.pipeline_mode<synchronous>, transform_indices = @transform_7, window_bounds = array<i64: 128, 64>}, {pipeline_mode = #tpu.pipeline_mode<synchronous>, transform_indices = @transform_8, window_bounds = array<i64: 1, 64>}, {pipeline_mode = #tpu.pipeline_mode<synchronous>, transform_indices = @transform_9, window_bounds = array<i64: 64, 10>}, {pipeline_mode = #tpu.pipeline_mode<synchronous>, transform_indices = @transform_10, window_bounds = array<i64: 1, 10>}, {transform_indices = @transform_11, window_bounds = array<i64: 128, 10>}]} {
    %c0 = arith.constant 0 : index
    %c0_0 = arith.constant 0 : index
    %0 = vector.load %arg1[%c0, %c0_0] : memref<128x784xf32, #tpu.memory_space<vmem>>, vector<128x784xf32>
    %1 = arith.truncf %0 : vector<128x784xf32> to vector<128x784xbf16>
    %c0_1 = arith.constant 0 : index
    %c0_2 = arith.constant 0 : index
    %2 = vector.load %arg2[%c0_1, %c0_2] : memref<784x512xbf16, #tpu.memory_space<vmem>>, vector<784x512xbf16>
    %cst = arith.constant dense<0.000000e+00> : vector<128x512xf32>
    %3 = tpu.matmul %1, %2, %cst {dimension_numbers = #tpu.dot_dimension_numbers<[1], [0], [0], [1], [0, 0, 1, 1], [], []>} : vector<128x784xbf16>, vector<784x512xbf16>, vector<128x512xf32> -> vector<128x512xf32>
    %c0_3 = arith.constant 0 : index
    %c0_4 = arith.constant 0 : index
    %4 = vector.load %arg3[%c0_3, %c0_4] : memref<1x512xf32, #tpu.memory_space<vmem>>, vector<1x512xf32>
    %5 = vector.broadcast %4 : vector<1x512xf32> to vector<128x512xf32>
    %6 = arith.addf %3, %5 : vector<128x512xf32>
    %cst_5 = arith.constant 0.000000e+00 : f32
    %7 = vector.broadcast %cst_5 : f32 to vector<128x512xf32>
    %8 = arith.maximumf %6, %7 : vector<128x512xf32>
    %9 = arith.truncf %8 : vector<128x512xf32> to vector<128x512xbf16>
    %c0_6 = arith.constant 0 : index
    %c0_7 = arith.constant 0 : index
    %10 = vector.load %arg4[%c0_6, %c0_7] : memref<512x256xbf16, #tpu.memory_space<vmem>>, vector<512x256xbf16>
    %cst_8 = arith.constant dense<0.000000e+00> : vector<128x256xf32>
    %11 = tpu.matmul %9, %10, %cst_8 {dimension_numbers = #tpu.dot_dimension_numbers<[1], [0], [0], [1], [0, 0, 1, 1], [], []>} : vector<128x512xbf16>, vector<512x256xbf16>, vector<128x256xf32> -> vector<128x256xf32>
    %c0_9 = arith.constant 0 : index
    %c0_10 = arith.constant 0 : index
    %12 = vector.load %arg5[%c0_9, %c0_10] : memref<1x256xf32, #tpu.memory_space<vmem>>, vector<1x256xf32>
    %13 = vector.broadcast %12 : vector<1x256xf32> to vector<128x256xf32>
    %14 = arith.addf %11, %13 : vector<128x256xf32>
    %cst_11 = arith.constant 0.000000e+00 : f32
    %15 = vector.broadcast %cst_11 : f32 to vector<128x256xf32>
    %16 = arith.maximumf %14, %15 : vector<128x256xf32>
    %17 = arith.truncf %16 : vector<128x256xf32> to vector<128x256xbf16>
    %c0_12 = arith.constant 0 : index
    %c0_13 = arith.constant 0 : index
    %18 = vector.load %arg6[%c0_12, %c0_13] : memref<256x128xbf16, #tpu.memory_space<vmem>>, vector<256x128xbf16>
    %cst_14 = arith.constant dense<0.000000e+00> : vector<128x128xf32>
    %19 = tpu.matmul %17, %18, %cst_14 {dimension_numbers = #tpu.dot_dimension_numbers<[1], [0], [0], [1], [0, 0, 1, 1], [], []>} : vector<128x256xbf16>, vector<256x128xbf16>, vector<128x128xf32> -> vector<128x128xf32>
    %c0_15 = arith.constant 0 : index
    %c0_16 = arith.constant 0 : index
    %20 = vector.load %arg7[%c0_15, %c0_16] : memref<1x128xf32, #tpu.memory_space<vmem>>, vector<1x128xf32>
    %21 = vector.broadcast %20 : vector<1x128xf32> to vector<128x128xf32>
    %22 = arith.addf %19, %21 : vector<128x128xf32>
    %cst_17 = arith.constant 0.000000e+00 : f32
    %23 = vector.broadcast %cst_17 : f32 to vector<128x128xf32>
    %24 = arith.maximumf %22, %23 : vector<128x128xf32>
    %25 = arith.truncf %24 : vector<128x128xf32> to vector<128x128xbf16>
    %c0_18 = arith.constant 0 : index
    %c0_19 = arith.constant 0 : index
    %26 = vector.load %arg8[%c0_18, %c0_19] : memref<128x64xbf16, #tpu.memory_space<vmem>>, vector<128x64xbf16>
    %cst_20 = arith.constant dense<0.000000e+00> : vector<128x64xf32>
    %27 = tpu.matmul %25, %26, %cst_20 {dimension_numbers = #tpu.dot_dimension_numbers<[1], [0], [0], [1], [0, 0, 1, 1], [], []>} : vector<128x128xbf16>, vector<128x64xbf16>, vector<128x64xf32> -> vector<128x64xf32>
    %c0_21 = arith.constant 0 : index
    %c0_22 = arith.constant 0 : index
    %28 = vector.load %arg9[%c0_21, %c0_22] : memref<1x64xf32, #tpu.memory_space<vmem>>, vector<1x64xf32>
    %29 = vector.broadcast %28 : vector<1x64xf32> to vector<128x64xf32>
    %30 = arith.addf %27, %29 : vector<128x64xf32>
    %cst_23 = arith.constant 5.000000e-01 : f32
    %31 = vector.broadcast %cst_23 : f32 to vector<128x64xf32>
    %32 = arith.mulf %31, %30 : vector<128x64xf32>
    %33 = math.tanh %32 : vector<128x64xf32>
    %cst_24 = arith.constant 5.000000e-01 : f32
    %34 = vector.broadcast %cst_24 : f32 to vector<128x64xf32>
    %35 = arith.mulf %34, %33 : vector<128x64xf32>
    %cst_25 = arith.constant 5.000000e-01 : f32
    %36 = vector.broadcast %cst_25 : f32 to vector<128x64xf32>
    %37 = arith.addf %35, %36 : vector<128x64xf32>
    %38 = arith.truncf %37 : vector<128x64xf32> to vector<128x64xbf16>
    %c0_26 = arith.constant 0 : index
    %c0_27 = arith.constant 0 : index
    %39 = vector.load %arg10[%c0_26, %c0_27] : memref<64x10xbf16, #tpu.memory_space<vmem>>, vector<64x10xbf16>
    %cst_28 = arith.constant dense<0.000000e+00> : vector<128x10xf32>
    %40 = tpu.matmul %38, %39, %cst_28 {dimension_numbers = #tpu.dot_dimension_numbers<[1], [0], [0], [1], [0, 0, 1, 1], [], []>} : vector<128x64xbf16>, vector<64x10xbf16>, vector<128x10xf32> -> vector<128x10xf32>
    %c0_29 = arith.constant 0 : index
    %c0_30 = arith.constant 0 : index
    %41 = vector.load %arg11[%c0_29, %c0_30] : memref<1x10xf32, #tpu.memory_space<vmem>>, vector<1x10xf32>
    %42 = vector.broadcast %41 : vector<1x10xf32> to vector<128x10xf32>
    %43 = arith.addf %40, %42 : vector<128x10xf32>
    %c0_31 = arith.constant 0 : index
    %c0_32 = arith.constant 0 : index
    %44 = vector.load %arg12[%c0_31, %c0_32] : memref<128x10xf32, #tpu.memory_space<vmem>>, vector<128x10xf32>
    tpu.vector_store %arg12[%c0_31, %c0_32], %43 {strides = array<i32>} : memref<128x10xf32, #tpu.memory_space<vmem>>, vector<128x10xf32>,
    return
  }
  func.func @transform_0(%arg0: i32) -> (i32, i32) {
    %c0_i32 = arith.constant 0 : i32
    %c0_i32_0 = arith.constant 0 : i32
    return %arg0, %c0_i32 : i32, i32
  }
  func.func @transform_1(%arg0: i32) -> (i32, i32) {
    %c0_i32 = arith.constant 0 : i32
    %c0_i32_0 = arith.constant 0 : i32
    %c0_i32_1 = arith.constant 0 : i32
    return %c0_i32, %c0_i32_0 : i32, i32
  }
  func.func @transform_2(%arg0: i32) -> (i32, i32) {
    %c0_i32 = arith.constant 0 : i32
    %c0_i32_0 = arith.constant 0 : i32
    %c0_i32_1 = arith.constant 0 : i32
    return %c0_i32, %c0_i32_0 : i32, i32
  }
  func.func @transform_3(%arg0: i32) -> (i32, i32) {
    %c0_i32 = arith.constant 0 : i32
    %c0_i32_0 = arith.constant 0 : i32
    %c0_i32_1 = arith.constant 0 : i32
    return %c0_i32, %c0_i32_0 : i32, i32
  }
  func.func @transform_4(%arg0: i32) -> (i32, i32) {
    %c0_i32 = arith.constant 0 : i32
    %c0_i32_0 = arith.constant 0 : i32
    %c0_i32_1 = arith.constant 0 : i32
    return %c0_i32, %c0_i32_0 : i32, i32
  }
  func.func @transform_5(%arg0: i32) -> (i32, i32) {
    %c0_i32 = arith.constant 0 : i32
    %c0_i32_0 = arith.constant 0 : i32
    %c0_i32_1 = arith.constant 0 : i32
    return %c0_i32, %c0_i32_0 : i32, i32
  }
  func.func @transform_6(%arg0: i32) -> (i32, i32) {
    %c0_i32 = arith.constant 0 : i32
    %c0_i32_0 = arith.constant 0 : i32
    %c0_i32_1 = arith.constant 0 : i32
    return %c0_i32, %c0_i32_0 : i32, i32
  }
  func.func @transform_7(%arg0: i32) -> (i32, i32) {
    %c0_i32 = arith.constant 0 : i32
    %c0_i32_0 = arith.constant 0 : i32
    %c0_i32_1 = arith.constant 0 : i32
    return %c0_i32, %c0_i32_0 : i32, i32
  }
  func.func @transform_8(%arg0: i32) -> (i32, i32) {
    %c0_i32 = arith.constant 0 : i32
    %c0_i32_0 = arith.constant 0 : i32
    %c0_i32_1 = arith.constant 0 : i32
    return %c0_i32, %c0_i32_0 : i32, i32
  }
  func.func @transform_9(%arg0: i32) -> (i32, i32) {
    %c0_i32 = arith.constant 0 : i32
    %c0_i32_0 = arith.constant 0 : i32
    %c0_i32_1 = arith.constant 0 : i32
    return %c0_i32, %c0_i32_0 : i32, i32
  }
  func.func @transform_10(%arg0: i32) -> (i32, i32) {
    %c0_i32 = arith.constant 0 : i32
    %c0_i32_0 = arith.constant 0 : i32
    %c0_i32_1 = arith.constant 0 : i32
    return %c0_i32, %c0_i32_0 : i32, i32
  }
  func.func @transform_11(%arg0: i32) -> (i32, i32) {
    %c0_i32 = arith.constant 0 : i32
    %c0_i32_0 = arith.constant 0 : i32
    return %arg0, %c0_i32 : i32, i32
  }
}

</mosaic_0001>

<bundles_post_ra>
// kernel: net_forward.1
= control target key start
LH: loop header
LB: loop body
LE: loop exit
PB: predicated region body
PF: predicated region fallthrough
CT: control target
= control target key end

     0   :  { %vm1405_vm0 = vcmask 130048   ;;  %vm3635_vm1 = vcmask 523264   ;;  %vm3757_vm2 = vcmask 80896   ;;  %s6589_s1 = inlined_call_operand.vmem [shape: bf16[784,512], index: 1, kind: input, shape index: {}]   ;;  %s6590_s0 = inlined_call_operand.vmem [shape: f32[128,784], index: 0, kind: input, shape index: {}]   ;;  %s6591_s3 = inlined_call_operand.vmem [shape: bf16[512,256], index: 3, kind: input, shape index: {}]   ;;  %s6592_s2 = inlined_call_operand.vmem [shape: f32[1,512], index: 2, kind: input, shape index: {}]   ;;  %s6593_s5 = inlined_call_operand.vmem [shape: bf16[256,128], index: 5, kind: input, shape index: {}]   ;;  %s6594_s7 = inlined_call_operand.vmem [shape: bf16[128,64], index: 7, kind: input, shape index: {}]   ;;  %s6595_s4 = inlined_call_operand.vmem [shape: f32[1,256], index: 4, kind: input, shape index: {}]   ;;  %s6596_s6 = inlined_call_operand.vmem [shape: f32[1,128], index: 6, kind: input, shape index: {}]   ;;  %s6597_s9 = inlined_call_operand.vmem [shape: bf16[64,10], index: 9, kind: input, shape index: {}]   ;;  %s6598_s8 = inlined_call_operand.vmem [shape: f32[1,64], index: 8, kind: input, shape index: {}]   ;;  %s6599_s10 = inlined_call_operand.vmem [shape: f32[1,10], index: 10, kind: input, shape index: {}]   ;;  %s6600_s11 = inlined_call_operand.vmem [shape: f32[128,10], index: 11, kind: output, shape index: {}]  }
   0x1   :  { %v4562_v0 = vld [vmem:[%s6589_s1 + $0x4] ss:$16 sps:$4 sm:$0xff]   ;;  %v4564_v1 = vld [vmem:[%s6589_s1 + $0xc] ss:$16 sps:$4 sm:$0xff]   ;;  %v4566_v2 = vld [vmem:[%s6589_s1] ss:$16 sps:$4 sm:$0xff]  }
   0x2   :  { %1430 = vmatprep.subr.bf16.mxu0 %v4562_v0  ;;  %v4567_v3 = vld [vmem:[%s6589_s1 + $0x8] ss:$16 sps:$4 sm:$0xff]   ;;  %1882 = vmatprep.subr.bf16.mxu1 %v4564_v1  ;;  %v4568_v4 = vld [vmem:[%s6589_s1 + $0x24] ss:$16 sps:$4 sm:$0xff]   ;;  %v4570_v5 = vld [vmem:[%s6589_s1 + $0x2c] ss:$16 sps:$4 sm:$0xff]  }
   0x3   :  { %1431 = vmatpush1.bf16.msra.mxu0 %v4566_v2  ;;  %1883 = vmatpush1.bf16.msra.mxu1 %v4567_v3  ;;  %v4572_v6 = vld [vmem:[%s6589_s1 + $0x20] ss:$16 sps:$4 sm:$0xff]   ;;  %v4573_v7 = vld [vmem:[%s6589_s1 + $0x28] ss:$16 sps:$4 sm:$0xff]   ;;  %v4574_v8 = vld [vmem:[%s6589_s1 + $0x44] ss:$16 sps:$4 sm:$0xff]  }
   0x4   :  { %1432 = vmatprep.subr.bf16.mxu0 %v4568_v4  ;;  %1884 = vmatprep.subr.bf16.mxu1 %v4570_v5  ;;  %v4576_v9 = vld [vmem:[%s6589_s1 + $0x4c] ss:$16 sps:$4 sm:$0xff]   ;;  %v4578_v10 = vld [vmem:[%s6589_s1 + $0x40] ss:$16 sps:$4 sm:$0xff]   ;;  %v4579_v11 = vld [vmem:[%s6589_s1 + $0x48] ss:$16 sps:$4 sm:$0xff]  }
   0x5   :  { %v4580_v12 = vld [vmem:[%s6589_s1 + $0x64] ss:$16 sps:$4 sm:$0xff]   ;;  %v4582_v13 = vld [vmem:[%s6589_s1 + $0x6c] ss:$16 sps:$4 sm:$0xff]   ;;  %v4584_v14 = vld [vmem:[%s6589_s1 + $0x60] ss:$16 sps:$4 sm:$0xff]  }
   0x6   :  { %v4585_v15 = vld [vmem:[%s6589_s1 + $0x68] ss:$16 sps:$4 sm:$0xff]   ;;  %v4586_v16 = vld [vmem:[%s6589_s1 + $0x84] ss:$16 sps:$4 sm:$0xff]   ;;  %v4588_v17 = vld [vmem:[%s6589_s1 + $0x8c] ss:$16 sps:$4 sm:$0xff]  }
   0x7   :  { %1433 = vmatpush1.bf16.msra.mxu0 %v4572_v6  ;;  %1885 = vmatpush1.bf16.msra.mxu1 %v4573_v7  ;;  %v4590_v18 = vld [vmem:[%s6589_s1 + $0x80] ss:$16 sps:$4 sm:$0xff]   ;;  %v4591_v19 = vld [vmem:[%s6589_s1 + $0x88] ss:$16 sps:$4 sm:$0xff]   ;;  %v4592_v20 = vld [vmem:[%s6589_s1 + $0xa4] ss:$16 sps:$4 sm:$0xff]  }
   0x8   :  { %1434 = vmatprep.subr.bf16.mxu0 %v4574_v8  ;;  %1886 = vmatprep.subr.bf16.mxu1 %v4576_v9  ;;  %v4594_v21 = vld [vmem:[%s6589_s1 + $0xac] ss:$16 sps:$4 sm:$0xff]   ;;  %v4596_v22 = vld [vmem:[%s6589_s1 + $0xa0] ss:$16 sps:$4 sm:$0xff]   ;;  %v4597_v23 = vld [vmem:[%s6589_s1 + $0xa8] ss:$16 sps:$4 sm:$0xff]  }
   0x9   :  { %v4598_v24 = vld [vmem:[%s6589_s1 + $0xc4] ss:$16 sps:$4 sm:$0xff]   ;;  %v4600_v25 = vld [vmem:[%s6589_s1 + $0xcc] ss:$16 sps:$4 sm:$0xff]   ;;  %v4602_v26 = vld [vmem:[%s6589_s1 + $0xc0] ss:$16 sps:$4 sm:$0xff]  }
   0xa   :  { %v4603_v27 = vld [vmem:[%s6589_s1 + $0xc8] ss:$16 sps:$4 sm:$0xff]   ;;  %v4604_v28 = vld [vmem:[%s6589_s1 + $0xe4] ss:$16 sps:$4 sm:$0xff]   ;;  %v4606_v29 = vld [vmem:[%s6589_s1 + $0xec] ss:$16 sps:$4 sm:$0xff]  }
   0xb   :  { %1435 = vmatpush1.bf16.msra.mxu0 %v4578_v10  ;;  %1887 = vmatpush1.bf16.msra.mxu1 %v4579_v11  ;;  %v4608_v30 = vld [vmem:[%s6589_s1 + $0xe0] ss:$16 sps:$4 sm:$0xff]   ;;  %v4609_v31 = vld [vmem:[%s6589_s1 + $0xe8] ss:$16 sps:$4 sm:$0xff]   ;;  %v4610_v32 = vld [vmem:[%s6589_s1 + $0x104] ss:$16 sps:$4 sm:$0xff]  }
   0xc   :  { %1436 = vmatprep.subr.bf16.mxu0 %v4580_v12  ;;  %1888 = vmatprep.subr.bf16.mxu1 %v4582_v13  ;;  %v4612_v33 = vld [vmem:[%s6589_s1 + $0x10c] ss:$16 sps:$4 sm:$0xff]   ;;  %v4614_v34 = vld [vmem:[%s6589_s1 + $0x100] ss:$16 sps:$4 sm:$0xff]   ;;  %v4615_v35 = vld [vmem:[%s6589_s1 + $0x108] ss:$16 sps:$4 sm:$0xff]  }
   0xd   :  { %v4616_v36 = vld [vmem:[%s6589_s1 + $0x124] ss:$16 sps:$4 sm:$0xff]   ;;  %v4618_v37 = vld [vmem:[%s6589_s1 + $0x12c] ss:$16 sps:$4 sm:$0xff]   ;;  %v4620_v38 = vld [vmem:[%s6589_s1 + $0x120] ss:$16 sps:$4 sm:$0xff]  }
   0xe   :  { %v4621_v39 = vld [vmem:[%s6589_s1 + $0x128] ss:$16 sps:$4 sm:$0xff]   ;;  %v4622_v40 = vld [vmem:[%s6589_s1 + $0x144] ss:$16 sps:$4 sm:$0xff]   ;;  %v4624_v41 = vld [vmem:[%s6589_s1 + $0x14c] ss:$16 sps:$4 sm:$0xff]  }
   0xf   :  { %1437 = vmatpush1.bf16.msra.mxu0 %v4584_v14  ;;  %1889 = vmatpush1.bf16.msra.mxu1 %v4585_v15  ;;  %v4626_v42 = vld [vmem:[%s6589_s1 + $0x140] ss:$16 sps:$4 sm:$0xff]   ;;  %v4627_v43 = vld [vmem:[%s6589_s1 + $0x148] ss:$16 sps:$4 sm:$0xff]   ;;  %v4628_v44 = vld [vmem:[%s6589_s1 + $0x164] ss:$16 sps:$4 sm:$0xff]  }
  0x10   :  { %1438 = vmatprep.subr.bf16.mxu0 %v4586_v16  ;;  %1890 = vmatprep.subr.bf16.mxu1 %v4588_v17  ;;  %v4630_v45 = vld [vmem:[%s6589_s1 + $0x16c] ss:$16 sps:$4 sm:$0xff]   ;;  %v4632_v47 = vld [vmem:[%s6589_s1 + $0x160] ss:$16 sps:$4 sm:$0xff]   ;;  %v4633_v48 = vld [vmem:[%s6589_s1 + $0x168] ss:$16 sps:$4 sm:$0xff]  }
  0x11   :  { %v40_v46 = vld [vmem:[%s6590_s0 + $0x8] sm:$0xff]  ;;  %v47_v49 = vld [vmem:[%s6590_s0 + $0x40] sm:$0xff]  ;;  %v46_v4 = vld [vmem:[%s6590_s0 + $0x38] sm:$0xff] }
  0x12   :  { %v4634_v50 = vld [vmem:[%s6589_s1 + $0x184] ss:$16 sps:$4 sm:$0xff]   ;;  %v152_v51 = vpack.c.bf16 %v47_v49, %v40_v46  ;;  %v4636_v52 = vld [vmem:[%s6589_s1 + $0x18c] ss:$16 sps:$4 sm:$0xff]   ;;  %v4638_v53 = vld [vmem:[%s6589_s1 + $0x180] ss:$16 sps:$4 sm:$0xff]  }
  0x13   :  { %1439 = vmatpush1.bf16.msra.mxu0 %v4590_v18  ;;  %1891 = vmatpush1.bf16.msra.mxu1 %v4591_v19  ;;  %v4639_v54 = vld [vmem:[%s6589_s1 + $0x188] ss:$16 sps:$4 sm:$0xff]   ;;  %v4640_v55 = vld [vmem:[%s6589_s1 + $0x1a4] ss:$16 sps:$4 sm:$0xff]   ;;  %v4642_v56 = vld [vmem:[%s6589_s1 + $0x1ac] ss:$16 sps:$4 sm:$0xff]  }
  0x14   :  { %1440 = vmatprep.subr.bf16.mxu0 %v4592_v20  ;;  %1892 = vmatprep.subr.bf16.mxu1 %v4594_v21  ;;  %v4644_v57 = vld [vmem:[%s6589_s1 + $0x1a0] ss:$16 sps:$4 sm:$0xff]   ;;  %v4645_v58 = vld [vmem:[%s6589_s1 + $0x1a8] ss:$16 sps:$4 sm:$0xff]   ;;  %v4646_v59 = vld [vmem:[%s6589_s1 + $0x1c4] ss:$16 sps:$4 sm:$0xff]  }
  0x15   :  { %1462 = vmatprep.mubr.bf16.mxu0 %v152_v51  ;;  %1914 = vmatprep.mubr.bf16.mxu1 %v152_v51  ;;  %v4648_v60 = vld [vmem:[%s6589_s1 + $0x1cc] ss:$16 sps:$4 sm:$0xff]   ;;  %v4650_v61 = vld [vmem:[%s6589_s1 + $0x1c0] ss:$16 sps:$4 sm:$0xff]   ;;  %v4651_v62 = vld [vmem:[%s6589_s1 + $0x1c8] ss:$16 sps:$4 sm:$0xff]  }
  0x16   :  { %v4652_v63 = vld [vmem:[%s6589_s1 + $0x1e4] ss:$16 sps:$4 sm:$0xff]   ;;  %v4654_v0 = vld [vmem:[%s6589_s1 + $0x1ec] ss:$16 sps:$4 sm:$0xff]   ;;  %v4656_v1 = vld [vmem:[%s6589_s1 + $0x1e0] ss:$16 sps:$4 sm:$0xff]  }
  0x17   :  { %1441 = vmatpush1.bf16.msra.mxu0 %v4596_v22  ;;  %1893 = vmatpush1.bf16.msra.mxu1 %v4597_v23  ;;  %v4657_v2 = vld [vmem:[%s6589_s1 + $0x1e8] ss:$16 sps:$4 sm:$0xff]   ;;  %v39_v3 = vld [vmem:[%s6590_s0] sm:$0xff]  ;;  %v4663_v6 = vld [vmem:[%s6589_s1 + $0x20c] ss:$16 sps:$4 sm:$0xff]  }
  0x18   :  { %1442 = vmatprep.subr.bf16.mxu0 %v4598_v24  ;;  %1894 = vmatprep.subr.bf16.mxu1 %v4600_v25  ;;  %v4660_v5 = vld [vmem:[%s6589_s1 + $0x204] ss:$16 sps:$4 sm:$0xff]   ;;  %v4658_v7 = vld [vmem:[%s6589_s1 + $0x200] ss:$16 sps:$4 sm:$0xff]   ;;  %v151_v8 = vpack.c.bf16 %v46_v4, %v39_v3  ;;  %v4661_v9 = vld [vmem:[%s6589_s1 + $0x208] ss:$16 sps:$4 sm:$0xff]  }
  0x19   :  { %v54_v10 = vld [vmem:[%s6590_s0 + $0x78] sm:$0xff]  ;;  %v61_v11 = vld [vmem:[%s6590_s0 + $0xb0] sm:$0xff]  ;;  %v60_v18 = vld [vmem:[%s6590_s0 + $0xa8] sm:$0xff] }
  0x1a   :  { %v4666_v12 = vld [vmem:[%s6589_s1 + $0x224] ss:$16 sps:$4 sm:$0xff]   ;;  %v4669_v13 = vld [vmem:[%s6589_s1 + $0x22c] ss:$16 sps:$4 sm:$0xff]   ;;  %v4664_v14 = vld [vmem:[%s6589_s1 + $0x220] ss:$16 sps:$4 sm:$0xff]   ;;  %v159_v15 = vpack.c.bf16 %v61_v11, %v54_v10 }
  0x1b   :  { %1443 = vmatpush1.bf16.msra.mxu0 %v4602_v26  ;;  %1895 = vmatpush1.bf16.msra.mxu1 %v4603_v27  ;;  %v4667_v16 = vld [vmem:[%s6589_s1 + $0x228] ss:$16 sps:$4 sm:$0xff]   ;;  %v53_v17 = vld [vmem:[%s6590_s0 + $0x70] sm:$0xff]  ;;  %v4675_v20 = vld [vmem:[%s6589_s1 + $0x24c] ss:$16 sps:$4 sm:$0xff]  }
  0x1c   :  { %1444 = vmatprep.subr.bf16.mxu0 %v4604_v28  ;;  %1896 = vmatprep.subr.bf16.mxu1 %v4606_v29  ;;  %v4672_v19 = vld [vmem:[%s6589_s1 + $0x244] ss:$16 sps:$4 sm:$0xff]   ;;  %v4670_v21 = vld [vmem:[%s6589_s1 + $0x240] ss:$16 sps:$4 sm:$0xff]   ;;  %v4673_v22 = vld [vmem:[%s6589_s1 + $0x248] ss:$16 sps:$4 sm:$0xff]   ;;  %v158_v23 = vpack.c.bf16 %v60_v18, %v53_v17 }
  0x1d   :  { %v68_v24 = vld [vmem:[%s6590_s0 + $0xe8] sm:$0xff]  ;;  %v75_v25 = vld [vmem:[%s6590_s0 + $0x120] sm:$0xff] }
  0x1e   :  { %v4678_v26 = vld [vmem:[%s6589_s1 + $0x264] ss:$16 sps:$4 sm:$0xff]   ;;  %v4681_v27 = vld [vmem:[%s6589_s1 + $0x26c] ss:$16 sps:$4 sm:$0xff]   ;;  %v166_v28 = vpack.c.bf16 %v75_v25, %v68_v24  ;;  %v4676_v29 = vld [vmem:[%s6589_s1 + $0x260] ss:$16 sps:$4 sm:$0xff]  }
  0x1f   :  { %1445 = vmatpush1.bf16.msra.mxu0 %v4608_v30  ;;  %1897 = vmatpush1.bf16.msra.mxu1 %v4609_v31  ;;  %v4679_v30 = vld [vmem:[%s6589_s1 + $0x268] ss:$16 sps:$4 sm:$0xff]   ;;  %v67_v31 = vld [vmem:[%s6590_s0 + $0xe0] sm:$0xff] }
  0x20   :  { %1446 = vmatprep.subr.bf16.mxu0 %v4610_v32  ;;  %1898 = vmatprep.subr.bf16.mxu1 %v4612_v33  ;;  %v74_v32 = vld [vmem:[%s6590_s0 + $0x118] sm:$0xff]  ;;  %v4684_v33 = vld [vmem:[%s6589_s1 + $0x284] ss:$16 sps:$4 sm:$0xff]   ;;  %v88_v46 = vld [vmem:[%s6590_s0 + $0x188] sm:$0xff] }
  0x21   :  { %v4694_v49 = vld [vmem:[%s6589_s1 + $0x2c0] ss:$16 sps:$4 sm:$0xff]   ;;  %v96_v51 = vld [vmem:[%s6590_s0 + $0x1c8] sm:$0xff]  ;;  %v4714_v4 = vld [vmem:[%s6589_s1 + $0x324] ss:$16 sps:$4 sm:$0xff]  }
  0x22   :  { %v4709_v3 = vld [vmem:[%s6589_s1 + $0x308] ss:$16 sps:$4 sm:$0xff]   ;;  %v4720_v11 = vld [vmem:[%s6589_s1 + $0x344] ss:$16 sps:$4 sm:$0xff]  }
  0x23   :  { %1447 = vmatpush1.bf16.msra.mxu0 %v4614_v34  ;;  %1899 = vmatpush1.bf16.msra.mxu1 %v4615_v35  ;;  %v4687_v34 = vld [vmem:[%s6589_s1 + $0x28c] ss:$16 sps:$4 sm:$0xff]   ;;  %v4682_v35 = vld [vmem:[%s6589_s1 + $0x280] ss:$16 sps:$4 sm:$0xff]   ;;  %v4726_v18 = vld [vmem:[%s6589_s1 + $0x364] ss:$16 sps:$4 sm:$0xff]  }
  0x24   :  { %1448 = vmatprep.subr.bf16.mxu0 %v4616_v36  ;;  %1900 = vmatprep.subr.bf16.mxu1 %v4618_v37  ;;  %v4685_v36 = vld [vmem:[%s6589_s1 + $0x288] ss:$16 sps:$4 sm:$0xff]   ;;  %v165_v37 = vpack.c.bf16 %v74_v32, %v67_v31  ;;  %v131_v17 = vld [vmem:[%s6590_s0 + $0x2e0] sm:$0xff]  ;;  %v145_v31 = vld [vmem:[%s6590_s0 + $0x350] sm:$0xff] }
  0x25   :  { %v116_v10 = vld [vmem:[%s6590_s0 + $0x268] sm:$0xff]  ;;  %v130_v24 = vld [vmem:[%s6590_s0 + $0x2d8] sm:$0xff]  ;;  %v4732_v25 = vld [vmem:[%s6589_s1 + $0x384] ss:$16 sps:$4 sm:$0xff]  }
  0x26   :  { %v4738_v32 = vld [vmem:[%s6589_s1 + $0x3a4] ss:$16 sps:$4 sm:$0xff]  }
  0x27   :  { %1449 = vmatpush1.bf16.msra.mxu0 %v4620_v38  ;;  %1901 = vmatpush1.bf16.msra.mxu1 %v4621_v39  ;;  %v82_v38 = vld [vmem:[%s6590_s0 + $0x158] sm:$0xff]  ;;  %v89_v39 = vld [vmem:[%s6590_s0 + $0x190] sm:$0xff] }
  0x28   :  { %1450 = vmatprep.subr.bf16.mxu0 %v4622_v40  ;;  %1902 = vmatprep.subr.bf16.mxu1 %v4624_v41  ;;  %v4690_v40 = vld [vmem:[%s6589_s1 + $0x2a4] ss:$16 sps:$4 sm:$0xff]   ;;  %v4693_v41 = vld [vmem:[%s6589_s1 + $0x2ac] ss:$16 sps:$4 sm:$0xff]  }
  0x2b   :  { %1451 = vmatpush1.bf16.msra.mxu0 %v4626_v42  ;;  %1903 = vmatpush1.bf16.msra.mxu1 %v4627_v43  ;;  %v4688_v42 = vld [vmem:[%s6589_s1 + $0x2a0] ss:$16 sps:$4 sm:$0xff]   ;;  %v173_v43 = vpack.c.bf16 %v89_v39, %v82_v38  ;;  %v144_v38 = vld [vmem:[%s6590_s0 + $0x348] sm:$0xff]  ;;  %v4744_v39 = vld [vmem:[%s6589_s1 + $0x3c4] ss:$16 sps:$4 sm:$0xff]  }
  0x2c   :  { %1452 = vmatprep.subr.bf16.mxu0 %v4628_v44  ;;  %1904 = vmatprep.subr.bf16.mxu1 %v4630_v45  ;;  %v4691_v44 = vld [vmem:[%s6589_s1 + $0x2a8] ss:$16 sps:$4 sm:$0xff]   ;;  %v81_v45 = vld [vmem:[%s6590_s0 + $0x150] sm:$0xff] }
  0x2f   :  { %1453 = vmatpush1.bf16.msra.mxu0 %v4632_v47  ;;  %1905 = vmatpush1.bf16.msra.mxu1 %v4633_v48  ;;  %v4696_v47 = vld [vmem:[%s6589_s1 + $0x2c4] ss:$16 sps:$4 sm:$0xff]   ;;  %v4699_v48 = vld [vmem:[%s6589_s1 + $0x2cc] ss:$16 sps:$4 sm:$0xff]  }
  0x30   :  { %1454 = vmatprep.subr.bf16.mxu0 %v4634_v50  ;;  %1906 = vmatprep.subr.bf16.mxu1 %v4636_v52  ;;  %v172_v50 = vpack.c.bf16 %v88_v46, %v81_v45  ;;  %v103_v52 = vld [vmem:[%s6590_s0 + $0x200] sm:$0xff]  ;;  %v49_v45 = vld [vmem:[%s6590_s0 + $0x50] sm:$0xff] }
  0x31   :  { %v4750_v46 = vld [vmem:[%s6589_s1 + $0x3e4] ss:$16 sps:$4 sm:$0xff]  }
  0x33   :  { %1455 = vmatpush1.bf16.msra.mxu0 %v4638_v53  ;;  %1907 = vmatpush1.bf16.msra.mxu1 %v4639_v54  ;;  %v4697_v53 = vld [vmem:[%s6589_s1 + $0x2c8] ss:$16 sps:$4 sm:$0xff]   ;;  %v4702_v54 = vld [vmem:[%s6589_s1 + $0x2e4] ss:$16 sps:$4 sm:$0xff]  }
  0x34   :  { %1456 = vmatprep.subr.bf16.mxu0 %v4640_v55  ;;  %1908 = vmatprep.subr.bf16.mxu1 %v4642_v56  ;;  %v4705_v55 = vld [vmem:[%s6589_s1 + $0x2ec] ss:$16 sps:$4 sm:$0xff]   ;;  %v4700_v56 = vld [vmem:[%s6589_s1 + $0x2e0] ss:$16 sps:$4 sm:$0xff]  }
  0x37   :  { %1457 = vmatpush1.bf16.msra.mxu0 %v4644_v57  ;;  %1909 = vmatpush1.bf16.msra.mxu1 %v4645_v58  ;;  %v4703_v57 = vld [vmem:[%s6589_s1 + $0x2e8] ss:$16 sps:$4 sm:$0xff]   ;;  %v180_v58 = vpack.c.bf16 %v103_v52, %v96_v51  ;;  %v41_v51 = vld [vmem:[%s6590_s0 + $0x10] sm:$0xff] }
  0x38   :  { %1458 = vmatprep.subr.bf16.mxu0 %v4646_v59  ;;  %1910 = vmatprep.subr.bf16.mxu1 %v4648_v60  ;;  %v95_v59 = vld [vmem:[%s6590_s0 + $0x1c0] sm:$0xff]  ;;  %v102_v60 = vld [vmem:[%s6590_s0 + $0x1f8] sm:$0xff]  ;;  %v48_v52 = vld [vmem:[%s6590_s0 + $0x48] sm:$0xff] }
  0x3b   :  { %1459 = vmatpush1.bf16.msra.mxu0 %v4650_v61  ;;  %1911 = vmatpush1.bf16.msra.mxu1 %v4651_v62  ;;  %v4708_v61 = vld [vmem:[%s6589_s1 + $0x304] ss:$16 sps:$4 sm:$0xff]   ;;  %v4711_v62 = vld [vmem:[%s6589_s1 + $0x30c] ss:$16 sps:$4 sm:$0xff]  }
  0x3c   :  { %1460 = vmatprep.subr.bf16.mxu0 %v4652_v63  ;;  %1912 = vmatprep.subr.bf16.mxu1 %v4654_v0  ;;  %v179_v63 = vpack.c.bf16 %v102_v60, %v95_v59  ;;  %v110_v0 = vld [vmem:[%s6590_s0 + $0x238] sm:$0xff]  ;;  %v4762_v60 = vld [vmem:[%s6589_s1 + $0x424] ss:$16 sps:$4 sm:$0xff]  }
  0x3d   :  { %v4757_v59 = vld [vmem:[%s6589_s1 + $0x408] ss:$16 sps:$4 sm:$0xff]  }
  0x3f   :  { %1461 = vmatpush1.bf16.msra.mxu0 %v4656_v1  ;;  %1913 = vmatpush1.bf16.msra.mxu1 %v4657_v2  ;;  %v117_v1 = vld [vmem:[%s6590_s0 + $0x270] sm:$0xff] }
  0x40   :  { %1543 = vmatprep.subr.bf16.mxu0 %v4660_v5  ;;  %1995 = vmatprep.subr.bf16.mxu1 %v4663_v6  ;;  %v4706_v2 = vld [vmem:[%s6589_s1 + $0x300] ss:$16 sps:$4 sm:$0xff]   ;;  %v4717_v5 = vld [vmem:[%s6589_s1 + $0x32c] ss:$16 sps:$4 sm:$0xff]  }
  0x41   :  { %v4712_v6 = vld [vmem:[%s6589_s1 + $0x320] ss:$16 sps:$4 sm:$0xff]  }
  0x42   :  { %1463 = vmatmul.mubr.bf16.vlgmr.msra.gmra.mrb[0].mxu0 %v151_v8  ;;  %1915 = vmatmul.mubr.bf16.vlgmr.msra.gmra.mrb[0].mxu1 %v151_v8  ;;  %v187_v8 = vpack.c.bf16 %v117_v1, %v110_v0  ;;  %v55_v1 = vld [vmem:[%s6590_s0 + $0x80] sm:$0xff] }
  0x43   :  { %1544 = vmatpush1.bf16.msra.mxu0 %v4658_v7  ;;  %1996 = vmatpush1.bf16.msra.mxu1 %v4661_v9  ;;  %v4715_v7 = vld [vmem:[%s6589_s1 + $0x328] ss:$16 sps:$4 sm:$0xff]   ;;  %v109_v9 = vld [vmem:[%s6590_s0 + $0x230] sm:$0xff] }
  0x44   :  { %1545 = vmatprep.subr.bf16.mxu0 %v4666_v12  ;;  %1997 = vmatprep.subr.bf16.mxu1 %v4669_v13  ;;  %v4723_v12 = vld [vmem:[%s6589_s1 + $0x34c] ss:$16 sps:$4 sm:$0xff]   ;;  %v4718_v13 = vld [vmem:[%s6589_s1 + $0x340] ss:$16 sps:$4 sm:$0xff]  }
  0x45   :  { %1472 = vmatprep.mubr.bf16.mxu0 %v159_v15  ;;  %1924 = vmatprep.mubr.bf16.mxu1 %v159_v15  ;;  %v4721_v15 = vld [vmem:[%s6589_s1 + $0x348] ss:$16 sps:$4 sm:$0xff]  }
  0x47   :  { %1546 = vmatpush1.bf16.msra.mxu0 %v4664_v14  ;;  %1998 = vmatpush1.bf16.msra.mxu1 %v4667_v16  ;;  %v186_v14 = vpack.c.bf16 %v116_v10, %v109_v9  ;;  %v124_v16 = vld [vmem:[%s6590_s0 + $0x2a8] sm:$0xff]  ;;  %v4774_v10 = vld [vmem:[%s6589_s1 + $0x464] ss:$16 sps:$4 sm:$0xff]  }
  0x48   :  { %1547 = vmatprep.subr.bf16.mxu0 %v4672_v19  ;;  %1999 = vmatprep.subr.bf16.mxu1 %v4675_v20  ;;  %v4729_v19 = vld [vmem:[%s6589_s1 + $0x36c] ss:$16 sps:$4 sm:$0xff]   ;;  %v4724_v20 = vld [vmem:[%s6589_s1 + $0x360] ss:$16 sps:$4 sm:$0xff]   ;;  %v4769_v9 = vld [vmem:[%s6589_s1 + $0x448] ss:$16 sps:$4 sm:$0xff]  }
  0x4a   :  { %1473 = vmatmul.mubr.bf16.gmra.mrb[4].mxu0 %v158_v23  ;;  %1925 = vmatmul.mubr.bf16.gmra.mrb[4].mxu1 %v158_v23  ;;  %v123_v23 = vld [vmem:[%s6590_s0 + $0x2a0] sm:$0xff] }
  0x4b   :  { %1548 = vmatpush1.bf16.msra.mxu0 %v4670_v21  ;;  %2000 = vmatpush1.bf16.msra.mxu1 %v4673_v22  ;;  %v194_v21 = vpack.c.bf16 %v131_v17, %v124_v16  ;;  %v4727_v22 = vld [vmem:[%s6589_s1 + $0x368] ss:$16 sps:$4 sm:$0xff]   ;;  %v4780_v17 = vld [vmem:[%s6589_s1 + $0x484] ss:$16 sps:$4 sm:$0xff]  }
  0x4c   :  { %1549 = vmatprep.subr.bf16.mxu0 %v4678_v26  ;;  %2001 = vmatprep.subr.bf16.mxu1 %v4681_v27  ;;  %v4735_v26 = vld [vmem:[%s6589_s1 + $0x38c] ss:$16 sps:$4 sm:$0xff]   ;;  %v4730_v27 = vld [vmem:[%s6589_s1 + $0x380] ss:$16 sps:$4 sm:$0xff]  }
  0x4d   :  { %1482 = vmatprep.mubr.bf16.mxu0 %v166_v28  ;;  %1934 = vmatprep.mubr.bf16.mxu1 %v166_v28  ;;  %v4733_v28 = vld [vmem:[%s6589_s1 + $0x388] ss:$16 sps:$4 sm:$0xff]  }
  0x4e   :  { %v76_v16 = vld [vmem:[%s6590_s0 + $0x128] sm:$0xff] }
  0x4f   :  { %1550 = vmatpush1.bf16.msra.mxu0 %v4676_v29  ;;  %2002 = vmatpush1.bf16.msra.mxu1 %v4679_v30  ;;  %v193_v29 = vpack.c.bf16 %v130_v24, %v123_v23  ;;  %v138_v30 = vld [vmem:[%s6590_s0 + $0x318] sm:$0xff]  ;;  %v91_v23 = vld [vmem:[%s6590_s0 + $0x1a0] sm:$0xff] }
  0x50   :  { %1551 = vmatprep.subr.bf16.mxu0 %v4684_v33  ;;  %2003 = vmatprep.subr.bf16.mxu1 %v4687_v34  ;;  %v4741_v33 = vld [vmem:[%s6589_s1 + $0x3ac] ss:$16 sps:$4 sm:$0xff]   ;;  %v201_v34 = vpack.c.bf16 %v145_v31, %v138_v30  ;;  %v4786_v24 = vld [vmem:[%s6589_s1 + $0x4a4] ss:$16 sps:$4 sm:$0xff]  }
  0x51   :  { %v90_v30 = vld [vmem:[%s6590_s0 + $0x198] sm:$0xff]  ;;  %v4792_v31 = vld [vmem:[%s6589_s1 + $0x4c4] ss:$16 sps:$4 sm:$0xff]  }
  0x52   :  { %1483 = vmatmul.mubr.bf16.gmra.mrb[8].mxu0 %v165_v37  ;;  %1935 = vmatmul.mubr.bf16.gmra.mrb[8].mxu1 %v165_v37  ;;  %v137_v37 = vld [vmem:[%s6590_s0 + $0x310] sm:$0xff] }
  0x53   :  { %1552 = vmatpush1.bf16.msra.mxu0 %v4682_v35  ;;  %2004 = vmatpush1.bf16.msra.mxu1 %v4685_v36  ;;  %v4736_v35 = vld [vmem:[%s6589_s1 + $0x3a0] ss:$16 sps:$4 sm:$0xff]   ;;  %v4739_v36 = vld [vmem:[%s6589_s1 + $0x3a8] ss:$16 sps:$4 sm:$0xff]  }
  0x54   :  { %1553 = vmatprep.subr.bf16.mxu0 %v4690_v40  ;;  %2005 = vmatprep.subr.bf16.mxu1 %v4693_v41  ;;  %v4747_v40 = vld [vmem:[%s6589_s1 + $0x3cc] ss:$16 sps:$4 sm:$0xff]   ;;  %v4742_v41 = vld [vmem:[%s6589_s1 + $0x3c0] ss:$16 sps:$4 sm:$0xff]  }
  0x55   :  { %1492 = vmatprep.mubr.bf16.mxu0 %v173_v43  ;;  %1944 = vmatprep.mubr.bf16.mxu1 %v173_v43  ;;  %v200_v43 = vpack.c.bf16 %v144_v38, %v137_v37  ;;  %v4793_v37 = vld [vmem:[%s6589_s1 + $0x4c8] ss:$16 sps:$4 sm:$0xff]   ;;  %v4798_v38 = vld [vmem:[%s6589_s1 + $0x4e4] ss:$16 sps:$4 sm:$0xff]  }
  0x57   :  { %1554 = vmatpush1.bf16.msra.mxu0 %v4688_v42  ;;  %2006 = vmatpush1.bf16.msra.mxu1 %v4691_v44  ;;  %v4745_v42 = vld [vmem:[%s6589_s1 + $0x3c8] ss:$16 sps:$4 sm:$0xff]  }
  0x58   :  { %1555 = vmatprep.subr.bf16.mxu0 %v4696_v47  ;;  %2007 = vmatprep.subr.bf16.mxu1 %v4699_v48  ;;  %v42_v44 = vld [vmem:[%s6590_s0 + $0x18] sm:$0xff]  ;;  %v4748_v48 = vld [vmem:[%s6589_s1 + $0x3e0] ss:$16 sps:$4 sm:$0xff]  }
  0x59   :  { %v4753_v47 = vld [vmem:[%s6589_s1 + $0x3ec] ss:$16 sps:$4 sm:$0xff]  }
  0x5a   :  { %1493 = vmatmul.mubr.bf16.gmra.mrb[12].mxu0 %v172_v50  ;;  %1945 = vmatmul.mubr.bf16.gmra.mrb[12].mxu1 %v172_v50  ;;  %v4751_v50 = vld [vmem:[%s6589_s1 + $0x3e8] ss:$16 sps:$4 sm:$0xff]  }
  0x5b   :  { %1556 = vmatpush1.bf16.msra.mxu0 %v4694_v49  ;;  %2008 = vmatpush1.bf16.msra.mxu1 %v4697_v53  ;;  %v154_v49 = vpack.c.bf16 %v49_v45, %v42_v44  ;;  %v4756_v53 = vld [vmem:[%s6589_s1 + $0x404] ss:$16 sps:$4 sm:$0xff]   ;;  %v104_v44 = vld [vmem:[%s6590_s0 + $0x208] sm:$0xff] }
  0x5c   :  { %1557 = vmatprep.subr.bf16.mxu0 %v4702_v54  ;;  %2009 = vmatprep.subr.bf16.mxu1 %v4705_v55  ;;  %v4759_v54 = vld [vmem:[%s6589_s1 + $0x40c] ss:$16 sps:$4 sm:$0xff]   ;;  %v4754_v55 = vld [vmem:[%s6589_s1 + $0x400] ss:$16 sps:$4 sm:$0xff]   ;;  %v4804_v45 = vld [vmem:[%s6589_s1 + $0x504] ss:$16 sps:$4 sm:$0xff]  }
  0x5d   :  { %1502 = vmatprep.mubr.bf16.mxu0 %v180_v58  ;;  %1954 = vmatprep.mubr.bf16.mxu1 %v180_v58  ;;  %v63_v58 = vld [vmem:[%s6590_s0 + $0xc0] sm:$0xff] }
  0x5f   :  { %1558 = vmatpush1.bf16.msra.mxu0 %v4700_v56  ;;  %2010 = vmatpush1.bf16.msra.mxu1 %v4703_v57  ;;  %v153_v56 = vpack.c.bf16 %v48_v52, %v41_v51  ;;  %v56_v57 = vld [vmem:[%s6590_s0 + $0x88] sm:$0xff]  ;;  %v4810_v52 = vld [vmem:[%s6589_s1 + $0x524] ss:$16 sps:$4 sm:$0xff]  }
  0x60   :  { %1559 = vmatprep.subr.bf16.mxu0 %v4708_v61  ;;  %2011 = vmatprep.subr.bf16.mxu1 %v4711_v62  ;;  %v4765_v61 = vld [vmem:[%s6589_s1 + $0x42c] ss:$16 sps:$4 sm:$0xff]   ;;  %v4760_v62 = vld [vmem:[%s6589_s1 + $0x420] ss:$16 sps:$4 sm:$0xff]   ;;  %v161_v0 = vpack.c.bf16 %v63_v58, %v56_v57  ;;  %v4805_v51 = vld [vmem:[%s6589_s1 + $0x508] ss:$16 sps:$4 sm:$0xff]  }
  0x61   :  { %v111_v57 = vld [vmem:[%s6590_s0 + $0x240] sm:$0xff]  ;;  %v118_v58 = vld [vmem:[%s6590_s0 + $0x278] sm:$0xff] }
  0x62   :  { %1503 = vmatmul.mubr.bf16.gmra.mrb[16].mxu0 %v179_v63  ;;  %1955 = vmatmul.mubr.bf16.gmra.mrb[16].mxu1 %v179_v63  ;;  %v4763_v63 = vld [vmem:[%s6589_s1 + $0x428] ss:$16 sps:$4 sm:$0xff]  }
  0x63   :  { %1560 = vmatpush1.bf16.msra.mxu0 %v4706_v2  ;;  %2012 = vmatpush1.bf16.msra.mxu1 %v4709_v3  ;;  %v62_v2 = vld [vmem:[%s6590_s0 + $0xb8] sm:$0xff]  ;;  %v4768_v3 = vld [vmem:[%s6589_s1 + $0x444] ss:$16 sps:$4 sm:$0xff]  }
  0x64   :  { %1561 = vmatprep.subr.bf16.mxu0 %v4714_v4  ;;  %2013 = vmatprep.subr.bf16.mxu1 %v4717_v5  ;;  %v4771_v4 = vld [vmem:[%s6589_s1 + $0x44c] ss:$16 sps:$4 sm:$0xff]   ;;  %v160_v5 = vpack.c.bf16 %v62_v2, %v55_v1  ;;  %v4817_v1 = vld [vmem:[%s6589_s1 + $0x548] ss:$16 sps:$4 sm:$0xff]   ;;  %v4822_v2 = vld [vmem:[%s6589_s1 + $0x564] ss:$16 sps:$4 sm:$0xff]  }
  0x65   :  { %1512 = vmatprep.mubr.bf16.mxu0 %v187_v8  ;;  %1964 = vmatprep.mubr.bf16.mxu1 %v187_v8  ;;  %v4766_v8 = vld [vmem:[%s6589_s1 + $0x440] ss:$16 sps:$4 sm:$0xff]  }
  0x67   :  { %1562 = vmatpush1.bf16.msra.mxu0 %v4712_v6  ;;  %2014 = vmatpush1.bf16.msra.mxu1 %v4715_v7  ;;  %v70_v6 = vld [vmem:[%s6590_s0 + $0xf8] sm:$0xff]  ;;  %v77_v7 = vld [vmem:[%s6590_s0 + $0x130] sm:$0xff] }
  0x68   :  { %1563 = vmatprep.subr.bf16.mxu0 %v4720_v11  ;;  %2015 = vmatprep.subr.bf16.mxu1 %v4723_v12  ;;  %v4777_v11 = vld [vmem:[%s6589_s1 + $0x46c] ss:$16 sps:$4 sm:$0xff]   ;;  %v4772_v12 = vld [vmem:[%s6589_s1 + $0x460] ss:$16 sps:$4 sm:$0xff]  }
  0x6a   :  { %1513 = vmatmul.mubr.bf16.gmra.mrb[20].mxu0 %v186_v14  ;;  %1965 = vmatmul.mubr.bf16.gmra.mrb[20].mxu1 %v186_v14  ;;  %v168_v14 = vpack.c.bf16 %v77_v7, %v70_v6  ;;  %v4823_v6 = vld [vmem:[%s6589_s1 + $0x568] ss:$16 sps:$4 sm:$0xff]   ;;  %v125_v7 = vld [vmem:[%s6590_s0 + $0x2b0] sm:$0xff] }
  0x6b   :  { %1564 = vmatpush1.bf16.msra.mxu0 %v4718_v13  ;;  %2016 = vmatpush1.bf16.msra.mxu1 %v4721_v15  ;;  %v4775_v13 = vld [vmem:[%s6589_s1 + $0x468] ss:$16 sps:$4 sm:$0xff]   ;;  %v69_v15 = vld [vmem:[%s6590_s0 + $0xf0] sm:$0xff] }
  0x6c   :  { %1565 = vmatprep.subr.bf16.mxu0 %v4726_v18  ;;  %2017 = vmatprep.subr.bf16.mxu1 %v4729_v19  ;;  %v4783_v18 = vld [vmem:[%s6589_s1 + $0x48c] ss:$16 sps:$4 sm:$0xff]   ;;  %v4778_v19 = vld [vmem:[%s6589_s1 + $0x480] ss:$16 sps:$4 sm:$0xff]  }
  0x6d   :  { %1522 = vmatprep.mubr.bf16.mxu0 %v194_v21  ;;  %1974 = vmatprep.mubr.bf16.mxu1 %v194_v21  ;;  %v4781_v21 = vld [vmem:[%s6589_s1 + $0x488] ss:$16 sps:$4 sm:$0xff]  }
  0x6f   :  { %1566 = vmatpush1.bf16.msra.mxu0 %v4724_v20  ;;  %2018 = vmatpush1.bf16.msra.mxu1 %v4727_v22  ;;  %v167_v20 = vpack.c.bf16 %v76_v16, %v69_v15  ;;  %v84_v22 = vld [vmem:[%s6590_s0 + $0x168] sm:$0xff]  ;;  %v4834_v16 = vld [vmem:[%s6589_s1 + $0x5a4] ss:$16 sps:$4 sm:$0xff]  }
  0x70   :  { %1567 = vmatprep.subr.bf16.mxu0 %v4732_v25  ;;  %2019 = vmatprep.subr.bf16.mxu1 %v4735_v26  ;;  %v4789_v25 = vld [vmem:[%s6589_s1 + $0x4ac] ss:$16 sps:$4 sm:$0xff]   ;;  %v4784_v26 = vld [vmem:[%s6589_s1 + $0x4a0] ss:$16 sps:$4 sm:$0xff]   ;;  %v4829_v15 = vld [vmem:[%s6589_s1 + $0x588] ss:$16 sps:$4 sm:$0xff]  }
  0x72   :  { %1523 = vmatmul.mubr.bf16.gmra.mrb[24].mxu0 %v193_v29  ;;  %1975 = vmatmul.mubr.bf16.gmra.mrb[24].mxu1 %v193_v29  ;;  %v83_v29 = vld [vmem:[%s6590_s0 + $0x160] sm:$0xff] }
  0x73   :  { %1568 = vmatpush1.bf16.msra.mxu0 %v4730_v27  ;;  %2020 = vmatpush1.bf16.msra.mxu1 %v4733_v28  ;;  %v175_v27 = vpack.c.bf16 %v91_v23, %v84_v22  ;;  %v4787_v28 = vld [vmem:[%s6589_s1 + $0x4a8] ss:$16 sps:$4 sm:$0xff]   ;;  %v4840_v23 = vld [vmem:[%s6589_s1 + $0x5c4] ss:$16 sps:$4 sm:$0xff]  }
  0x74   :  { %1569 = vmatprep.subr.bf16.mxu0 %v4738_v32  ;;  %2021 = vmatprep.subr.bf16.mxu1 %v4741_v33  ;;  %v4795_v32 = vld [vmem:[%s6589_s1 + $0x4cc] ss:$16 sps:$4 sm:$0xff]   ;;  %v174_v33 = vpack.c.bf16 %v90_v30, %v83_v29  ;;  %v4841_v29 = vld [vmem:[%s6589_s1 + $0x5c8] ss:$16 sps:$4 sm:$0xff]   ;;  %v4846_v30 = vld [vmem:[%s6589_s1 + $0x5e4] ss:$16 sps:$4 sm:$0xff]  }
  0x75   :  { %1532 = vmatprep.mubr.bf16.mxu0 %v201_v34  ;;  %1984 = vmatprep.mubr.bf16.mxu1 %v201_v34  ;;  %v98_v34 = vld [vmem:[%s6590_s0 + $0x1d8] sm:$0xff] }
  0x76   :  { %v146_v22 = vld [vmem:[%s6590_s0 + $0x358] sm:$0xff] }
  0x77   :  { %1570 = vmatpush1.bf16.msra.mxu0 %v4736_v35  ;;  %2022 = vmatpush1.bf16.msra.mxu1 %v4739_v36  ;;  %v105_v35 = vld [vmem:[%s6590_s0 + $0x210] sm:$0xff] }
  0x78   :  { %1571 = vmatprep.subr.bf16.mxu0 %v4744_v39  ;;  %2023 = vmatprep.subr.bf16.mxu1 %v4747_v40  ;;  %v4790_v36 = vld [vmem:[%s6589_s1 + $0x4c0] ss:$16 sps:$4 sm:$0xff]   ;;  %v4801_v39 = vld [vmem:[%s6589_s1 + $0x4ec] ss:$16 sps:$4 sm:$0xff]   ;;  %v182_v40 = vpack.c.bf16 %v105_v35, %v98_v34 }
  0x79   :  { %v43_v35 = vld [vmem:[%s6590_s0 + $0x20] sm:$0xff] }
  0x7a   :  { %1533 = vmatmul.mubr.bf16.gmra.mrb[28].mxu0 %v200_v43  ;;  %1985 = vmatmul.mubr.bf16.gmra.mrb[28].mxu1 %v200_v43  ;;  %v97_v43 = vld [vmem:[%s6590_s0 + $0x1d0] sm:$0xff] }
  0x7b   :  { %1572 = vmatpush1.bf16.msra.mxu0 %v4742_v41  ;;  %2024 = vmatpush1.bf16.msra.mxu1 %v4745_v42  ;;  %v4796_v41 = vld [vmem:[%s6589_s1 + $0x4e0] ss:$16 sps:$4 sm:$0xff]   ;;  %v4799_v42 = vld [vmem:[%s6589_s1 + $0x4e8] ss:$16 sps:$4 sm:$0xff]  }
  0x7c   :  { %1573 = vmatprep.subr.bf16.mxu0 %v4750_v46  ;;  %2025 = vmatprep.subr.bf16.mxu1 %v4753_v47  ;;  %v4807_v46 = vld [vmem:[%s6589_s1 + $0x50c] ss:$16 sps:$4 sm:$0xff]   ;;  %v181_v47 = vpack.c.bf16 %v104_v44, %v97_v43  ;;  %v4853_v44 = vld [vmem:[%s6589_s1 + $0x608] ss:$16 sps:$4 sm:$0xff]  }
  0x7d   :  { %1575 = vmatprep.mubr.bf16.mxu0 %v154_v49  ;;  %2027 = vmatprep.mubr.bf16.mxu1 %v154_v49  ;;  %v119_v49 = vld [vmem:[%s6590_s0 + $0x280] sm:$0xff] }
  0x7f   :  { %1574 = vmatpush1.bf16.msra.mxu0 %v4748_v48  ;;  %2026 = vmatpush1.bf16.msra.mxu1 %v4751_v50  ;;  %v112_v48 = vld [vmem:[%s6590_s0 + $0x248] sm:$0xff]  ;;  %v4802_v50 = vld [vmem:[%s6589_s1 + $0x500] ss:$16 sps:$4 sm:$0xff]  }
  0x80   :  { %1656 = vmatprep.subr.bf16.mxu0 %v4756_v53  ;;  %2108 = vmatprep.subr.bf16.mxu1 %v4759_v54  ;;  %v4813_v53 = vld [vmem:[%s6589_s1 + $0x52c] ss:$16 sps:$4 sm:$0xff]   ;;  %v189_v54 = vpack.c.bf16 %v119_v49, %v112_v48  ;;  %v79_v49 = vld [vmem:[%s6590_s0 + $0x140] sm:$0xff] }
  0x81   :  { %v72_v48 = vld [vmem:[%s6590_s0 + $0x108] sm:$0xff] }
  0x82   :  { %1576 = vmatmul.mubr.bf16.vlgmr.msra.gmra.mrb[0].mxu0 %v153_v56  ;;  %2028 = vmatmul.mubr.bf16.vlgmr.msra.gmra.mrb[0].mxu1 %v153_v56  ;;  %v4811_v56 = vld [vmem:[%s6589_s1 + $0x528] ss:$16 sps:$4 sm:$0xff]  }
  0x83   :  { %1657 = vmatpush1.bf16.msra.mxu0 %v4754_v55  ;;  %2109 = vmatpush1.bf16.msra.mxu1 %v4757_v59  ;;  %v4808_v55 = vld [vmem:[%s6589_s1 + $0x520] ss:$16 sps:$4 sm:$0xff]   ;;  %v4816_v59 = vld [vmem:[%s6589_s1 + $0x544] ss:$16 sps:$4 sm:$0xff]  }
  0x84   :  { %1658 = vmatprep.subr.bf16.mxu0 %v4762_v60  ;;  %2110 = vmatprep.subr.bf16.mxu1 %v4765_v61  ;;  %v4819_v60 = vld [vmem:[%s6589_s1 + $0x54c] ss:$16 sps:$4 sm:$0xff]   ;;  %v188_v61 = vpack.c.bf16 %v118_v58, %v111_v57  ;;  %v85_v58 = vld [vmem:[%s6590_s0 + $0x170] sm:$0xff] }
  0x85   :  { %1585 = vmatprep.mubr.bf16.mxu0 %v161_v0  ;;  %2037 = vmatprep.mubr.bf16.mxu1 %v161_v0  ;;  %v4814_v0 = vld [vmem:[%s6589_s1 + $0x540] ss:$16 sps:$4 sm:$0xff]  }
  0x87   :  { %1659 = vmatpush1.bf16.msra.mxu0 %v4760_v62  ;;  %2111 = vmatpush1.bf16.msra.mxu1 %v4763_v63  ;;  %v126_v62 = vld [vmem:[%s6590_s0 + $0x2b8] sm:$0xff]  ;;  %v133_v63 = vld [vmem:[%s6590_s0 + $0x2f0] sm:$0xff] }
  0x88   :  { %1660 = vmatprep.subr.bf16.mxu0 %v4768_v3  ;;  %2112 = vmatprep.subr.bf16.mxu1 %v4771_v4  ;;  %v4825_v3 = vld [vmem:[%s6589_s1 + $0x56c] ss:$16 sps:$4 sm:$0xff]   ;;  %v196_v4 = vpack.c.bf16 %v133_v63, %v126_v62 }
  0x8a   :  { %1586 = vmatmul.mubr.bf16.gmra.mrb[4].mxu0 %v160_v5  ;;  %2038 = vmatmul.mubr.bf16.gmra.mrb[4].mxu1 %v160_v5  ;;  %v4820_v5 = vld [vmem:[%s6589_s1 + $0x560] ss:$16 sps:$4 sm:$0xff]  }
  0x8b   :  { %1661 = vmatpush1.bf16.msra.mxu0 %v4766_v8  ;;  %2113 = vmatpush1.bf16.msra.mxu1 %v4769_v9  ;;  %v132_v8 = vld [vmem:[%s6590_s0 + $0x2e8] sm:$0xff]  ;;  %v4828_v9 = vld [vmem:[%s6589_s1 + $0x584] ss:$16 sps:$4 sm:$0xff]  }
  0x8c   :  { %1662 = vmatprep.subr.bf16.mxu0 %v4774_v10  ;;  %2114 = vmatprep.subr.bf16.mxu1 %v4777_v11  ;;  %v4831_v10 = vld [vmem:[%s6589_s1 + $0x58c] ss:$16 sps:$4 sm:$0xff]   ;;  %v195_v11 = vpack.c.bf16 %v132_v8, %v125_v7 }
  0x8d   :  { %1595 = vmatprep.mubr.bf16.mxu0 %v168_v14  ;;  %2047 = vmatprep.mubr.bf16.mxu1 %v168_v14  ;;  %v4826_v14 = vld [vmem:[%s6589_s1 + $0x580] ss:$16 sps:$4 sm:$0xff]   ;;  %v120_v7 = vld [vmem:[%s6590_s0 + $0x288] sm:$0xff] }
  0x8e   :  { %v128_v8 = vld [vmem:[%s6590_s0 + $0x2c8] sm:$0xff] }
  0x8f   :  { %1663 = vmatpush1.bf16.msra.mxu0 %v4772_v12  ;;  %2115 = vmatpush1.bf16.msra.mxu1 %v4775_v13  ;;  %v140_v12 = vld [vmem:[%s6590_s0 + $0x328] sm:$0xff]  ;;  %v147_v13 = vld [vmem:[%s6590_s0 + $0x360] sm:$0xff] }
  0x90   :  { %1664 = vmatprep.subr.bf16.mxu0 %v4780_v17  ;;  %2116 = vmatprep.subr.bf16.mxu1 %v4783_v18  ;;  %v4837_v17 = vld [vmem:[%s6589_s1 + $0x5ac] ss:$16 sps:$4 sm:$0xff]   ;;  %v203_v18 = vpack.c.bf16 %v147_v13, %v140_v12  ;;  %v127_v12 = vld [vmem:[%s6590_s0 + $0x2c0] sm:$0xff] }
  0x91   :  { %v134_v13 = vld [vmem:[%s6590_s0 + $0x2f8] sm:$0xff] }
  0x92   :  { %1596 = vmatmul.mubr.bf16.gmra.mrb[8].mxu0 %v167_v20  ;;  %2048 = vmatmul.mubr.bf16.gmra.mrb[8].mxu1 %v167_v20  ;;  %v4835_v20 = vld [vmem:[%s6589_s1 + $0x5a8] ss:$16 sps:$4 sm:$0xff]  }
  0x93   :  { %1665 = vmatpush1.bf16.msra.mxu0 %v4778_v19  ;;  %2117 = vmatpush1.bf16.msra.mxu1 %v4781_v21  ;;  %v4832_v19 = vld [vmem:[%s6589_s1 + $0x5a0] ss:$16 sps:$4 sm:$0xff]  }
  0x94   :  { %1666 = vmatprep.subr.bf16.mxu0 %v4786_v24  ;;  %2118 = vmatprep.subr.bf16.mxu1 %v4789_v25  ;;  %v139_v21 = vld [vmem:[%s6590_s0 + $0x320] sm:$0xff]  ;;  %v4843_v24 = vld [vmem:[%s6589_s1 + $0x5cc] ss:$16 sps:$4 sm:$0xff]  }
  0x95   :  { %1605 = vmatprep.mubr.bf16.mxu0 %v175_v27  ;;  %2057 = vmatprep.mubr.bf16.mxu1 %v175_v27  ;;  %v202_v25 = vpack.c.bf16 %v146_v22, %v139_v21  ;;  %v51_v27 = vld [vmem:[%s6590_s0 + $0x60] sm:$0xff]  ;;  %v5012_v21 = vmov 0   ;;  %v45_v22 = vld [vmem:[%s6590_s0 + $0x30] sm:$0xff] }
  0x97   :  { %1667 = vmatpush1.bf16.msra.mxu0 %v4784_v26  ;;  %2119 = vmatpush1.bf16.msra.mxu1 %v4787_v28  ;;  %v44_v26 = vld [vmem:[%s6590_s0 + $0x28] sm:$0xff]  ;;  %v4838_v28 = vld [vmem:[%s6589_s1 + $0x5c0] ss:$16 sps:$4 sm:$0xff]  }
  0x98   :  { %1668 = vmatprep.subr.bf16.mxu0 %v4792_v31  ;;  %2120 = vmatprep.subr.bf16.mxu1 %v4795_v32  ;;  %v4849_v31 = vld [vmem:[%s6589_s1 + $0x5ec] ss:$16 sps:$4 sm:$0xff]   ;;  %v4844_v32 = vld [vmem:[%s6589_s1 + $0x5e0] ss:$16 sps:$4 sm:$0xff]   ;;  %v156_v34 = vpack.c.bf16 %v51_v27, %v44_v26 }
  0x99   :  { %v4861_v26 = vld [vmem:[%s6591_s3 + $0x14] ss:$8 sps:$4 sm:$0xff]   ;;  %v59_v27 = vld [vmem:[%s6590_s0 + $0xa0] sm:$0xff] }
  0x9a   :  { %1606 = vmatmul.mubr.bf16.gmra.mrb[12].mxu0 %v174_v33  ;;  %2058 = vmatmul.mubr.bf16.gmra.mrb[12].mxu1 %v174_v33  ;;  %v4847_v33 = vld [vmem:[%s6589_s1 + $0x5e8] ss:$16 sps:$4 sm:$0xff]  }
  0x9b   :  { %1669 = vmatpush1.bf16.msra.mxu0 %v4790_v36  ;;  %2121 = vmatpush1.bf16.msra.mxu1 %v4793_v37  ;;  %v50_v36 = vld [vmem:[%s6590_s0 + $0x58] sm:$0xff]  ;;  %v4852_v37 = vld [vmem:[%s6589_s1 + $0x604] ss:$16 sps:$4 sm:$0xff]  }
  0x9c   :  { %1670 = vmatprep.subr.bf16.mxu0 %v4798_v38  ;;  %2122 = vmatprep.subr.bf16.mxu1 %v4801_v39  ;;  %v58_v38 = vld [vmem:[%s6590_s0 + $0x98] sm:$0xff]  ;;  %v65_v39 = vld [vmem:[%s6590_s0 + $0xd0] sm:$0xff] }
  0x9d   :  { %1615 = vmatprep.mubr.bf16.mxu0 %v182_v40  ;;  %2067 = vmatprep.mubr.bf16.mxu1 %v182_v40  ;;  %v4855_v40 = vld [vmem:[%s6589_s1 + $0x60c] ss:$16 sps:$4 sm:$0xff]   ;;  %v163_v43 = vpack.c.bf16 %v65_v39, %v58_v38  ;;  %v4868_v39 = vld [vmem:[%s6591_s3 + $0x40] ss:$8 sps:$4 sm:$0xff]  }
  0x9f   :  { %1671 = vmatpush1.bf16.msra.mxu0 %v4796_v41  ;;  %2123 = vmatpush1.bf16.msra.mxu1 %v4799_v42  ;;  %v155_v41 = vpack.c.bf16 %v50_v36, %v43_v35  ;;  %v4850_v42 = vld [vmem:[%s6589_s1 + $0x600] ss:$16 sps:$4 sm:$0xff]   ;;  %v80_v35 = vld [vmem:[%s6590_s0 + $0x148] sm:$0xff] }
  0xa0   :  { %1672 = vmatprep.subr.bf16.mxu0 %v4804_v45  ;;  %2124 = vmatprep.subr.bf16.mxu1 %v4807_v46  ;;  %v4858_v45 = vld [vmem:[%s6591_s3 + $0x4] ss:$8 sps:$4 sm:$0xff]   ;;  %v57_v46 = vld [vmem:[%s6590_s0 + $0x90] sm:$0xff] }
  0xa1   :  { %v4865_v36 = vld [vmem:[%s6591_s3 + $0x30] ss:$8 sps:$4 sm:$0xff]  }
  0xa2   :  { %1616 = vmatmul.mubr.bf16.gmra.mrb[16].mxu0 %v181_v47  ;;  %2068 = vmatmul.mubr.bf16.gmra.mrb[16].mxu1 %v181_v47  ;;  %v64_v47 = vld [vmem:[%s6590_s0 + $0xc8] sm:$0xff] }
  0xa3   :  { %1673 = vmatpush1.bf16.msra.mxu0 %v4802_v50  ;;  %2125 = vmatpush1.bf16.msra.mxu1 %v4805_v51  ;;  %v162_v50 = vpack.c.bf16 %v64_v47, %v57_v46  ;;  %v170_v51 = vpack.c.bf16 %v79_v49, %v72_v48  ;;  %v4874_v46 = vld [vmem:[%s6591_s3 + $0x60] ss:$8 sps:$4 sm:$0xff]   ;;  %v4879_v47 = vld [vmem:[%s6591_s3 + $0x74] ss:$8 sps:$4 sm:$0xff]  }
  0xa4   :  { %1674 = vmatprep.subr.bf16.mxu0 %v4810_v52  ;;  %2126 = vmatprep.subr.bf16.mxu1 %v4813_v53  ;;  %v71_v52 = vld [vmem:[%s6590_s0 + $0x100] sm:$0xff]  ;;  %v78_v53 = vld [vmem:[%s6590_s0 + $0x138] sm:$0xff]  ;;  %v101_v48 = vld [vmem:[%s6590_s0 + $0x1f0] sm:$0xff] }
  0xa5   :  { %1625 = vmatprep.mubr.bf16.mxu0 %v189_v54  ;;  %2077 = vmatprep.mubr.bf16.mxu1 %v189_v54  ;;  %v86_v54 = vld [vmem:[%s6590_s0 + $0x178] sm:$0xff]  ;;  %v108_v49 = vld [vmem:[%s6590_s0 + $0x228] sm:$0xff] }
  0xa7   :  { %1675 = vmatpush1.bf16.msra.mxu0 %v4808_v55  ;;  %2127 = vmatpush1.bf16.msra.mxu1 %v4811_v56  ;;  %v93_v55 = vld [vmem:[%s6590_s0 + $0x1b0] sm:$0xff]  ;;  %v169_v56 = vpack.c.bf16 %v78_v53, %v71_v52  ;;  %v185_v52 = vpack.c.bf16 %v108_v49, %v101_v48  ;;  %v4880_v53 = vld [vmem:[%s6591_s3 + $0x80] ss:$8 sps:$4 sm:$0xff]  }
  0xa8   :  { %1676 = vmatprep.subr.bf16.mxu0 %v4816_v59  ;;  %2128 = vmatprep.subr.bf16.mxu1 %v4819_v60  ;;  %v177_v57 = vpack.c.bf16 %v93_v55, %v86_v54  ;;  %v92_v59 = vld [vmem:[%s6590_s0 + $0x1a8] sm:$0xff]  ;;  %v4885_v54 = vld [vmem:[%s6591_s3 + $0x94] ss:$8 sps:$4 sm:$0xff]   ;;  %v115_v55 = vld [vmem:[%s6590_s0 + $0x260] sm:$0xff] }
  0xa9   :  { %v100_v60 = vld [vmem:[%s6590_s0 + $0x1e8] sm:$0xff]  ;;  %v176_v62 = vpack.c.bf16 %v92_v59, %v85_v58  ;;  %v4953_v48 = vld [vmem:[%s6593_s5] sm:$0xff]  }
  0xaa   :  { %1626 = vmatmul.mubr.bf16.gmra.mrb[20].mxu0 %v188_v61  ;;  %2078 = vmatmul.mubr.bf16.gmra.mrb[20].mxu1 %v188_v61  ;;  %v107_v61 = vld [vmem:[%s6590_s0 + $0x220] sm:$0xff] }
  0xab   :  { %1677 = vmatpush1.bf16.msra.mxu0 %v4814_v0  ;;  %2129 = vmatpush1.bf16.msra.mxu1 %v4817_v1  ;;  %v184_v63 = vpack.c.bf16 %v107_v61, %v100_v60  ;;  %v99_v0 = vld [vmem:[%s6590_s0 + $0x1e0] sm:$0xff]  ;;  %v106_v1 = vld [vmem:[%s6590_s0 + $0x218] sm:$0xff] }
  0xac   :  { %1678 = vmatprep.subr.bf16.mxu0 %v4822_v2  ;;  %2130 = vmatprep.subr.bf16.mxu1 %v4825_v3  ;;  %v114_v2 = vld [vmem:[%s6590_s0 + $0x258] sm:$0xff]  ;;  %v121_v3 = vld [vmem:[%s6590_s0 + $0x290] sm:$0xff]  ;;  %v4888_v58 = vld [vmem:[%s6591_s3 + $0xa4] ss:$8 sps:$4 sm:$0xff]  }
  0xad   :  { %1635 = vmatprep.mubr.bf16.mxu0 %v196_v4  ;;  %2087 = vmatprep.mubr.bf16.mxu1 %v196_v4  ;;  %v183_v4 = vpack.c.bf16 %v106_v1, %v99_v0  ;;  %v4886_v60 = vld [vmem:[%s6591_s3 + $0xa0] ss:$8 sps:$4 sm:$0xff]   ;;  %v4891_v61 = vld [vmem:[%s6591_s3 + $0xb4] ss:$8 sps:$4 sm:$0xff]   ;;  %v4889_v0 = vld [vmem:[%s6591_s3 + $0xb0] ss:$8 sps:$4 sm:$0xff]  }
  0xae   :  { %v4894_v1 = vld [vmem:[%s6591_s3 + $0xc4] ss:$8 sps:$4 sm:$0xff]  }
  0xaf   :  { %1679 = vmatpush1.bf16.msra.mxu0 %v4820_v5  ;;  %2131 = vmatpush1.bf16.msra.mxu1 %v4823_v6  ;;  %v191_v5 = vpack.c.bf16 %v121_v3, %v114_v2  ;;  %v113_v6 = vld [vmem:[%s6590_s0 + $0x250] sm:$0xff]  ;;  %v4892_v3 = vld [vmem:[%s6591_s3 + $0xc0] ss:$8 sps:$4 sm:$0xff]  }
  0xb0   :  { %1680 = vmatprep.subr.bf16.mxu0 %v4828_v9  ;;  %2132 = vmatprep.subr.bf16.mxu1 %v4831_v10  ;;  %v135_v9 = vld [vmem:[%s6590_s0 + $0x300] sm:$0xff]  ;;  %v190_v10 = vpack.c.bf16 %v120_v7, %v113_v6  ;;  %v150_v6 = vld [vmem:[%s6590_s0 + $0x378] sm:$0xff] }
  0xb1   :  { %v4895_v7 = vld [vmem:[%s6591_s3 + $0xd0] ss:$8 sps:$4 sm:$0xff]  }
  0xb2   :  { %1636 = vmatmul.mubr.bf16.gmra.mrb[24].mxu0 %v195_v11  ;;  %2088 = vmatmul.mubr.bf16.gmra.mrb[24].mxu1 %v195_v11  ;;  %v198_v11 = vpack.c.bf16 %v135_v9, %v128_v8  ;;  %v4900_v9 = vld [vmem:[%s6591_s3 + $0xe4] ss:$8 sps:$4 sm:$0xff]  }
  0xb3   :  { %1681 = vmatpush1.bf16.msra.mxu0 %v4826_v14  ;;  %2133 = vmatpush1.bf16.msra.mxu1 %v4829_v15  ;;  %v142_v14 = vld [vmem:[%s6590_s0 + $0x338] sm:$0xff]  ;;  %v149_v15 = vld [vmem:[%s6590_s0 + $0x370] sm:$0xff] }
  0xb4   :  { %1682 = vmatprep.subr.bf16.mxu0 %v4834_v16  ;;  %2134 = vmatprep.subr.bf16.mxu1 %v4837_v17  ;;  %v197_v16 = vpack.c.bf16 %v134_v13, %v127_v12  ;;  %v205_v17 = vpack.c.bf16 %v149_v15, %v142_v14  ;;  %v4901_v12 = vld [vmem:[%s6591_s3 + $0xf0] ss:$8 sps:$4 sm:$0xff]   ;;  %v4906_v13 = vld [vmem:[%s6591_s3 + $0x104] ss:$8 sps:$4 sm:$0xff]   ;;  %v405_v14 = vlaneseq }
  0xb5   :  { %1645 = vmatprep.mubr.bf16.mxu0 %v203_v18  ;;  %2097 = vmatprep.mubr.bf16.mxu1 %v203_v18  ;;  %v141_v18 = vld [vmem:[%s6590_s0 + $0x330] sm:$0xff] }
  0xb6   :  { %v6128_v15 = vshrl.u32 %v405_v14, 7 }
  0xb7   :  { %1683 = vmatpush1.bf16.msra.mxu0 %v4832_v19  ;;  %2135 = vmatpush1.bf16.msra.mxu1 %v4835_v20  ;;  %v148_v19 = vld [vmem:[%s6590_s0 + $0x368] sm:$0xff] }
  0xb8   :  { %1684 = vmatprep.subr.bf16.mxu0 %v4840_v23  ;;  %2136 = vmatprep.subr.bf16.mxu1 %v4843_v24  ;;  %v204_v20 = vpack.c.bf16 %v148_v19, %v141_v18  ;;  %v52_v23 = vld [vmem:[%s6590_s0 + $0x68] sm:$0xff]  ;;  %v403_v18 = vld [vmem:[%s6592_s2] sm:$0xf]  ;;  %v411_v19 = vsub.s32 1, %v6128_v15 }
  0xb9   :  { %v157_v24 = vpack.c.bf16 %v52_v23, %v45_v22 }
  0xba   :  { %1646 = vmatmul.mubr.bf16.gmra.mrb[28].mxu0 %v202_v25  ;;  %2098 = vmatmul.mubr.bf16.gmra.mrb[28].mxu1 %v202_v25  ;;  %v4856_v25 = vld [vmem:[%s6591_s3] ss:$8 sps:$4 sm:$0xff]   ;;  %v6145_v23 = vrot.slane %v403_v18, %v411_v19 }
  0xbb   :  { %1685 = vmatpush1.bf16.msra.mxu0 %v4838_v28  ;;  %2137 = vmatpush1.bf16.msra.mxu1 %v4841_v29  ;;  %v66_v28 = vld [vmem:[%s6590_s0 + $0xd8] sm:$0xff] }
  0xbc   :  { %1686 = vmatprep.subr.bf16.mxu0 %v4846_v30  ;;  %2138 = vmatprep.subr.bf16.mxu1 %v4849_v31  ;;  %v4859_v29 = vld [vmem:[%s6591_s3 + $0x10] ss:$8 sps:$4 sm:$0xff]   ;;  %v4864_v30 = vld [vmem:[%s6591_s3 + $0x24] ss:$8 sps:$4 sm:$0xff]   ;;  %v164_v31 = vpack.c.bf16 %v66_v28, %v59_v27 }
  0xbd   :  { %1688 = vmatprep.mubr.bf16.mxu0 %v156_v34  ;;  %2140 = vmatprep.mubr.bf16.mxu1 %v156_v34  ;;  %v73_v34 = vld [vmem:[%s6590_s0 + $0x110] sm:$0xff] }
  0xbe   :  { %v171_v38 = vpack.c.bf16 %v80_v35, %v73_v34 }
  0xbf   :  { %1687 = vmatpush1.bf16.msra.mxu0 %v4844_v32  ;;  %2139 = vmatpush1.bf16.msra.mxu1 %v4847_v33  ;;  %v4862_v32 = vld [vmem:[%s6591_s3 + $0x20] ss:$8 sps:$4 sm:$0xff]   ;;  %v4867_v33 = vld [vmem:[%s6591_s3 + $0x34] ss:$8 sps:$4 sm:$0xff]  }
  0xc0   :  { %1769 = vmatprep.subr.bf16.mxu0 %v4852_v37  ;;  %2221 = vmatprep.subr.bf16.mxu1 %v4855_v40  ;;  %v4870_v37 = vld [vmem:[%s6591_s3 + $0x44] ss:$8 sps:$4 sm:$0xff]   ;;  %v4873_v40 = vld [vmem:[%s6591_s3 + $0x54] ss:$8 sps:$4 sm:$0xff]  }
  0xc2   :  { %1689 = vmatmul.mubr.bf16.vlgmr.msra.gmra.mrb[0].mxu0 %v155_v41  ;;  %2141 = vmatmul.mubr.bf16.vlgmr.msra.gmra.mrb[0].mxu1 %v155_v41  ;;  %v87_v41 = vld [vmem:[%s6590_s0 + $0x180] sm:$0xff] }
  0xc3   :  { %1770 = vmatpush1.bf16.msra.mxu0 %v4850_v42  ;;  %1698 = vmatprep.mubr.bf16.mxu0 %v163_v43  ;;  %v94_v42 = vld [vmem:[%s6590_s0 + $0x1b8] sm:$0xff] }
  0xc4   :  { %2150 = vmatprep.mubr.bf16.mxu1 %v163_v43  ;;  %2222 = vmatpush1.bf16.msra.mxu1 %v4853_v44  ;;  %v4871_v43 = vld [vmem:[%s6591_s3 + $0x50] ss:$8 sps:$4 sm:$0xff]   ;;  %v4876_v44 = vld [vmem:[%s6591_s3 + $0x64] ss:$8 sps:$4 sm:$0xff]  }
  0xc5   :  { %2826 = vmatprep.subr.bf16.mxu0 %v4858_v45  ;;  %v178_v45 = vpack.c.bf16 %v94_v42, %v87_v41 }
  0xca   :  { %1699 = vmatmul.mubr.bf16.gmra.mrb[4].mxu0 %v162_v50  ;;  %2151 = vmatmul.mubr.bf16.gmra.mrb[4].mxu1 %v162_v50  ;;  %v4877_v50 = vld [vmem:[%s6591_s3 + $0x70] ss:$8 sps:$4 sm:$0xff]  }
  0xcb   :  { %1708 = vmatprep.mubr.bf16.mxu0 %v170_v51  ;;  %2160 = vmatprep.mubr.bf16.mxu1 %v170_v51  ;;  %v4882_v51 = vld [vmem:[%s6591_s3 + $0x84] ss:$8 sps:$4 sm:$0xff]  }
  0xd2   :  { %1709 = vmatmul.mubr.bf16.gmra.mrb[8].mxu0 %v169_v56  ;;  %2161 = vmatmul.mubr.bf16.gmra.mrb[8].mxu1 %v169_v56  ;;  %v122_v56 = vld [vmem:[%s6590_s0 + $0x298] sm:$0xff] }
  0xd3   :  { %1718 = vmatprep.mubr.bf16.mxu0 %v177_v57  ;;  %2170 = vmatprep.mubr.bf16.mxu1 %v177_v57  ;;  %v4883_v57 = vld [vmem:[%s6591_s3 + $0x90] ss:$8 sps:$4 sm:$0xff]   ;;  %v192_v59 = vpack.c.bf16 %v122_v56, %v115_v55  ;;  %v4954_v55 = vld [vmem:[%s6593_s5 + $0x48] sm:$0xff]  }
  0xda   :  { %1719 = vmatmul.mubr.bf16.gmra.mrb[12].mxu0 %v176_v62  ;;  %2171 = vmatmul.mubr.bf16.gmra.mrb[12].mxu1 %v176_v62  ;;  %v129_v62 = vld [vmem:[%s6590_s0 + $0x2d0] sm:$0xff] }
  0xdb   :  { %1728 = vmatprep.mubr.bf16.mxu0 %v184_v63  ;;  %2180 = vmatprep.mubr.bf16.mxu1 %v184_v63  ;;  %v136_v63 = vld [vmem:[%s6590_s0 + $0x308] sm:$0xff] }
  0xdc   :  { %v199_v2 = vpack.c.bf16 %v136_v63, %v129_v62 }
  0xe2   :  { %1729 = vmatmul.mubr.bf16.gmra.mrb[16].mxu0 %v183_v4  ;;  %2181 = vmatmul.mubr.bf16.gmra.mrb[16].mxu1 %v183_v4  ;;  %v4897_v4 = vld [vmem:[%s6591_s3 + $0xd4] ss:$8 sps:$4 sm:$0xff]  }
  0xe3   :  { %1738 = vmatprep.mubr.bf16.mxu0 %v191_v5  ;;  %2190 = vmatprep.mubr.bf16.mxu1 %v191_v5  ;;  %v143_v5 = vld [vmem:[%s6590_s0 + $0x340] sm:$0xff] }
  0xe4   :  { %v206_v8 = vpack.c.bf16 %v150_v6, %v143_v5  ;;  %v4907_v6 = vld [vmem:[%s6591_s3 + $0x110] ss:$8 sps:$4 sm:$0xff]  }
  0xea   :  { %1739 = vmatmul.mubr.bf16.gmra.mrb[20].mxu0 %v190_v10  ;;  %2191 = vmatmul.mubr.bf16.gmra.mrb[20].mxu1 %v190_v10  ;;  %v4898_v10 = vld [vmem:[%s6591_s3 + $0xe0] ss:$8 sps:$4 sm:$0xff]  }
  0xeb   :  { %1748 = vmatprep.mubr.bf16.mxu0 %v198_v11  ;;  %2200 = vmatprep.mubr.bf16.mxu1 %v198_v11  ;;  %v4903_v11 = vld [vmem:[%s6591_s3 + $0xf4] ss:$8 sps:$4 sm:$0xff]  }
  0xf2   :  { %1749 = vmatmul.mubr.bf16.gmra.mrb[24].mxu0 %v197_v16  ;;  %2201 = vmatmul.mubr.bf16.gmra.mrb[24].mxu1 %v197_v16  ;;  %v407_v16 = vsub.s32 0, %v6128_v15 }
  0xf3   :  { %1758 = vmatprep.mubr.bf16.mxu0 %v205_v17  ;;  %2210 = vmatprep.mubr.bf16.mxu1 %v205_v17  ;;  %v415_v17 = vsub.s32 2, %v6128_v15 }
  0xf5   :  { %v6141_v22 = vrot.slane %v403_v18, %v415_v17 }
  0xfa   :  { %1759 = vmatmul.mubr.bf16.gmra.mrb[28].mxu0 %v204_v20  ;;  %2211 = vmatmul.mubr.bf16.gmra.mrb[28].mxu1 %v204_v20  ;;  %v419_v20 = vsub.s32 3, %v6128_v15 }
  0xfb   :  { %1801 = vmatprep.mubr.bf16.mxu0 %v5012_v21  ;;  %2253 = vmatprep.mubr.bf16.mxu1 %v5012_v21 }
 0x102   :  { %3974 = vmatmul.mubr.msk.bf16.vlgmr.msra.gmra.mrb[0].mxu0 %vm1405_vm0, %v157_v24  ;;  %3982 = vmatmul.mubr.msk.bf16.vlgmr.msra.gmra.mrb[0].mxu1 %vm1405_vm0, %v157_v24  ;;  %v6147_v24 = vrot.slane %v403_v18, %v419_v20  ;;  %v4958_v20 = vld [vmem:[%s6593_s5 + $0x58] sm:$0xff]  }
 0x103   :  { %1811 = vmatprep.mubr.bf16.mxu0 %v5012_v21  ;;  %2263 = vmatprep.mubr.bf16.mxu1 %v5012_v21 }
 0x104   :  { %2827 = vmatpush1.bf16.msra.mxu0 %v4856_v25 }
 0x105   :  { %2828 = vmatprep.subr.bf16.mxu0 %v4861_v26 }
 0x108   :  { %2829 = vmatpush1.bf16.msra.mxu0 %v4859_v29 }
 0x109   :  { %2830 = vmatprep.subr.bf16.mxu0 %v4864_v30 }
 0x10a   :  { %3975 = vmatmul.mubr.msk.bf16.gmra.mrb[4].mxu0 %vm1405_vm0, %v164_v31  ;;  %3983 = vmatmul.mubr.msk.bf16.gmra.mrb[4].mxu1 %vm1405_vm0, %v164_v31 }
 0x10b   :  { %1821 = vmatprep.mubr.bf16.mxu0 %v5012_v21  ;;  %2273 = vmatprep.mubr.bf16.mxu1 %v5012_v21 }
 0x10c   :  { %2831 = vmatpush1.bf16.msra.mxu0 %v4862_v32 }
 0x10d   :  { %2832 = vmatprep.subr.bf16.mxu0 %v4867_v33 }
 0x110   :  { %2833 = vmatpush1.bf16.msra.mxu0 %v4865_v36 }
 0x111   :  { %2834 = vmatprep.subr.bf16.mxu0 %v4870_v37 }
 0x112   :  { %3976 = vmatmul.mubr.msk.bf16.gmra.mrb[8].mxu0 %vm1405_vm0, %v171_v38  ;;  %3984 = vmatmul.mubr.msk.bf16.gmra.mrb[8].mxu1 %vm1405_vm0, %v171_v38 }
 0x113   :  { %1831 = vmatprep.mubr.bf16.mxu0 %v5012_v21  ;;  %2283 = vmatprep.mubr.bf16.mxu1 %v5012_v21 }
 0x114   :  { %2835 = vmatpush1.bf16.msra.mxu0 %v4868_v39 }
 0x115   :  { %2836 = vmatprep.subr.bf16.mxu0 %v4873_v40 }
 0x118   :  { %2837 = vmatpush1.bf16.msra.mxu0 %v4871_v43 }
 0x119   :  { %2838 = vmatprep.subr.bf16.mxu0 %v4876_v44 }
 0x11a   :  { %3977 = vmatmul.mubr.msk.bf16.gmra.mrb[12].mxu0 %vm1405_vm0, %v178_v45  ;;  %3985 = vmatmul.mubr.msk.bf16.gmra.mrb[12].mxu1 %vm1405_vm0, %v178_v45 }
 0x11b   :  { %1841 = vmatprep.mubr.bf16.mxu0 %v5012_v21  ;;  %2293 = vmatprep.mubr.bf16.mxu1 %v5012_v21 }
 0x11c   :  { %2839 = vmatpush1.bf16.msra.mxu0 %v4874_v46 }
 0x11d   :  { %2840 = vmatprep.subr.bf16.mxu0 %v4879_v47  ;;  %v4952_v47 = vld [vmem:[%s6593_s5 + $0x40] sm:$0xff]  }
 0x11e   :  { %4093 = vmatprep.subr.bf16.mxu1 %v4952_v47 }
 0x11f   :  { %4094 = vmatpush3.bf16.msra.mxu1 %v4953_v48 }
 0x120   :  { %2841 = vmatpush1.bf16.msra.mxu0 %v4877_v50  ;;  %4095 = vmatprep.subr.bf16.mxu1 %v4954_v55  ;;  %v4918_v55 = vld [vmem:[%s6591_s3 + $0x144] ss:$8 sps:$4 sm:$0xff]  }
 0x121   :  { %2842 = vmatprep.subr.bf16.mxu0 %v4882_v51  ;;  %v4904_v51 = vld [vmem:[%s6591_s3 + $0x100] ss:$8 sps:$4 sm:$0xff]  }
 0x122   :  { %3978 = vmatmul.mubr.msk.bf16.gmra.mrb[16].mxu0 %vm1405_vm0, %v185_v52  ;;  %3986 = vmatmul.mubr.msk.bf16.gmra.mrb[16].mxu1 %vm1405_vm0, %v185_v52 }
 0x123   :  { %1851 = vmatprep.mubr.bf16.mxu0 %v5012_v21  ;;  %2303 = vmatprep.mubr.bf16.mxu1 %v5012_v21 }
 0x124   :  { %2843 = vmatpush1.bf16.msra.mxu0 %v4880_v53 }
 0x125   :  { %2844 = vmatprep.subr.bf16.mxu0 %v4885_v54  ;;  %v4909_v54 = vld [vmem:[%s6591_s3 + $0x114] ss:$8 sps:$4 sm:$0xff]  }
 0x128   :  { %2845 = vmatpush1.bf16.msra.mxu0 %v4883_v57 }
 0x129   :  { %2846 = vmatprep.subr.bf16.mxu0 %v4888_v58 }
 0x12a   :  { %3979 = vmatmul.mubr.msk.bf16.gmra.mrb[20].mxu0 %vm1405_vm0, %v192_v59  ;;  %3987 = vmatmul.mubr.msk.bf16.gmra.mrb[20].mxu1 %vm1405_vm0, %v192_v59 }
 0x12b   :  { %1861 = vmatprep.mubr.bf16.mxu0 %v5012_v21  ;;  %2313 = vmatprep.mubr.bf16.mxu1 %v5012_v21 }
 0x12c   :  { %2847 = vmatpush1.bf16.msra.mxu0 %v4886_v60  ;;  %v4955_v60 = vld [vmem:[%s6593_s5 + $0x8] sm:$0xff]  }
 0x12d   :  { %2848 = vmatprep.subr.bf16.mxu0 %v4891_v61  ;;  %v4956_v61 = vld [vmem:[%s6593_s5 + $0x50] sm:$0xff]   ;;  %4096 = vmatpush3.bf16.msra.mxu1 %v4955_v60  ;;  %v4962_v60 = vld [vmem:[%s6593_s5 + $0x68] sm:$0xff]  }
 0x12e   :  { %4097 = vmatprep.subr.bf16.mxu1 %v4956_v61 }
 0x130   :  { %2849 = vmatpush1.bf16.msra.mxu0 %v4889_v0 }
 0x131   :  { %2850 = vmatprep.subr.bf16.mxu0 %v4894_v1 }
 0x132   :  { %3980 = vmatmul.mubr.msk.bf16.gmra.mrb[24].mxu0 %vm1405_vm0, %v199_v2  ;;  %3988 = vmatmul.mubr.msk.bf16.gmra.mrb[24].mxu1 %vm1405_vm0, %v199_v2 }
 0x133   :  { %1871 = vmatprep.mubr.bf16.mxu0 %v5012_v21  ;;  %2323 = vmatprep.mubr.bf16.mxu1 %v5012_v21  ;;  %v6139_v21 = vrot.slane %v403_v18, %v407_v16 }
 0x134   :  { %2851 = vmatpush1.bf16.msra.mxu0 %v4892_v3 }
 0x135   :  { %2852 = vmatprep.subr.bf16.mxu0 %v4897_v4 }
 0x138   :  { %2853 = vmatpush1.bf16.msra.mxu0 %v4895_v7 }
 0x139   :  { %2854 = vmatprep.subr.bf16.mxu0 %v4900_v9 }
 0x13a   :  { %3981 = vmatmul.mubr.msk.bf16.gmra.mrb[28].mxu0 %vm1405_vm0, %v206_v8  ;;  %3989 = vmatmul.mubr.msk.bf16.gmra.mrb[28].mxu1 %vm1405_vm0, %v206_v8 }
 0x13c   :  { %2855 = vmatpush1.bf16.msra.mxu0 %v4898_v10 }
 0x13d   :  { %2856 = vmatprep.subr.bf16.mxu0 %v4903_v11 }
 0x140   :  { %2857 = vmatpush1.bf16.msra.mxu0 %v4901_v12  ;;  %v4912_v12 = vld [vmem:[%s6591_s3 + $0x124] ss:$8 sps:$4 sm:$0xff]  }
 0x141   :  { %2939 = vmatprep.subr.bf16.mxu0 %v4906_v13  ;;  %v4957_v13 = vld [vmem:[%s6593_s5 + $0x10] sm:$0xff]  }
 0x142   :  { %4098 = vmatpush3.bf16.msra.mxu1 %v4957_v13 }
 0x143   :  { %4099 = vmatprep.subr.bf16.mxu1 %v4958_v20  ;;  %v4921_v20 = vld [vmem:[%s6591_s3 + $0x154] ss:$8 sps:$4 sm:$0xff]  }
 0x1d5   :  { %v1803_v25 = vpop.f32.mrb[0].mxu0  ;;  %v2255_v26 = vpop.f32.mrb[0].mxu1 }
 0x1d6   :  { %v4241_v27 = vadd.f32 %v1803_v25, %v6139_v21  ;;  %v4273_v28 = vadd.f32 %v2255_v26, %v6141_v22  ;;  %v1805_v29 = vpop.f32.mrb[1].mxu0  ;;  %v2257_v30 = vpop.f32.mrb[1].mxu1 }
 0x1d7   :  { %v4242_v31 = vadd.f32 %v1805_v29, %v6145_v23  ;;  %v4274_v32 = vadd.f32 %v2257_v30, %v6147_v24  ;;  %v1807_v33 = vpop.f32.mrb[2].mxu0  ;;  %v2259_v34 = vpop.f32.mrb[2].mxu1 }
 0x1d8   :  { %v2334_v35 = vmax.f32 %v4241_v27, 0.0  ;;  %v2336_v36 = vmax.f32 %v4273_v28, 0.0  ;;  %v4243_v37 = vadd.f32 %v1807_v33, %v6139_v21  ;;  %v4275_v38 = vadd.f32 %v2259_v34, %v6141_v22  ;;  %v1809_v39 = vpop.f32.mrb[3].mxu0  ;;  %v2261_v40 = vpop.f32.mrb[3].mxu1  ;;  %v4915_v34 = vld [vmem:[%s6591_s3 + $0x134] ss:$8 sps:$4 sm:$0xff]  }
 0x1d9   :  { %v2335_v41 = vmax.f32 %v4242_v31, 0.0  ;;  %v2337_v42 = vmax.f32 %v4274_v32, 0.0  ;;  %v4244_v43 = vadd.f32 %v1809_v39, %v6145_v23  ;;  %v4276_v44 = vadd.f32 %v2261_v40, %v6147_v24  ;;  %v4910_v31 = vld [vmem:[%s6591_s3 + $0x120] ss:$8 sps:$4 sm:$0xff]   ;;  %v4959_v39 = vld [vmem:[%s6593_s5 + $0x18] sm:$0xff]  }
 0x1da   :  { %v2338_v45 = vmax.f32 %v4243_v37, 0.0  ;;  %v2340_v46 = vmax.f32 %v4275_v38, 0.0  ;;  %v4960_v40 = vld [vmem:[%s6593_s5 + $0x60] sm:$0xff]   ;;  %4100 = vmatpush3.bf16.msra.mxu1 %v4959_v39  ;;  %v4965_v39 = vld [vmem:[%s6593_s5 + $0x30] sm:$0xff]  }
 0x1db   :  { %v2339_v49 = vmax.f32 %v4244_v43, 0.0  ;;  %v2341_v50 = vmax.f32 %v4276_v44, 0.0  ;;  %4101 = vmatprep.subr.bf16.mxu1 %v4960_v40 }
 0x1dc   :  { %v2398_v52 = vpack.c.bf16 %v2338_v45, %v2334_v35  ;;  %v6166_v53 = vpack.c.bf16 %v2340_v46, %v2336_v36 }
 0x1dd   :  { %v2399_v56 = vpack.c.bf16 %v2339_v49, %v2335_v41  ;;  %v6174_v57 = vpack.c.bf16 %v2341_v50, %v2337_v42  ;;  %v1813_v58 = vpop.f32.mrb[4].mxu0  ;;  %v2265_v59 = vpop.f32.mrb[4].mxu1  ;;  %v4913_v49 = vld [vmem:[%s6591_s3 + $0x130] ss:$8 sps:$4 sm:$0xff]  }
 0x1de   :  { %v4245_v62 = vadd.f32 %v1813_v58, %v6139_v21  ;;  %v4277_v63 = vadd.f32 %v2265_v59, %v6141_v22  ;;  %v1815_v0 = vpop.f32.mrb[5].mxu0  ;;  %v2267_v1 = vpop.f32.mrb[5].mxu1 }
 0x1df   :  { %v4246_v2 = vadd.f32 %v1815_v0, %v6145_v23  ;;  %v4278_v3 = vadd.f32 %v2267_v1, %v6147_v24  ;;  %v1817_v4 = vpop.f32.mrb[6].mxu0  ;;  %v2269_v5 = vpop.f32.mrb[6].mxu1  ;;  %2858 = vmatprep.mubr.bf16.mxu0 %v2399_v56  ;;  %v4961_v56 = vld [vmem:[%s6593_s5 + $0x20] sm:$0xff]  }
 0x1e0   :  { %v2342_v7 = vmax.f32 %v4245_v62, 0.0  ;;  %v4247_v8 = vadd.f32 %v1817_v4, %v6139_v21  ;;  %v4279_v9 = vadd.f32 %v2269_v5, %v6141_v22  ;;  %v1819_v10 = vpop.f32.mrb[7].mxu0  ;;  %v2271_v11 = vpop.f32.mrb[7].mxu1  ;;  %2859 = vmatmul.mubr.bf16.vlgmr.msra.gmra.mrb[32].mxu0 %v2398_v52  ;;  %v2344_v14 = vmax.f32 %v4277_v63, 0.0  ;;  %4102 = vmatpush3.bf16.msra.mxu1 %v4961_v56  ;;  %v4922_v56 = vld [vmem:[%s6591_s3 + $0x160] ss:$8 sps:$4 sm:$0xff]  }
 0x1e1   :  { %v4248_v17 = vadd.f32 %v1819_v10, %v6145_v23  ;;  %v4280_v18 = vadd.f32 %v2271_v11, %v6147_v24  ;;  %2940 = vmatpush1.bf16.msra.mxu0 %v4904_v51  ;;  %v2343_v27 = vmax.f32 %v4246_v2, 0.0  ;;  %v2345_v28 = vmax.f32 %v4278_v3, 0.0  ;;  %v4916_v11 = vld [vmem:[%s6591_s3 + $0x140] ss:$8 sps:$4 sm:$0xff]   ;;  %4103 = vmatprep.subr.bf16.mxu1 %v4962_v60 }
 0x1e2   :  { %v2346_v25 = vmax.f32 %v4247_v8, 0.0  ;;  %v2348_v26 = vmax.f32 %v4279_v9, 0.0  ;;  %2941 = vmatprep.subr.bf16.mxu0 %v4909_v54 }
 0x1e3   :  { %v2347_v29 = vmax.f32 %v4248_v17, 0.0  ;;  %v2349_v30 = vmax.f32 %v4280_v18, 0.0 }
 0x1e4   :  { %v2402_v32 = vpack.c.bf16 %v2346_v25, %v2342_v7  ;;  %v6205_v33 = vpack.c.bf16 %v2348_v26, %v2344_v14  ;;  %v4964_v25 = vld [vmem:[%s6593_s5 + $0x70] sm:$0xff]  }
 0x1e5   :  { %v2403_v35 = vpack.c.bf16 %v2347_v29, %v2343_v27  ;;  %v6210_v36 = vpack.c.bf16 %v2349_v30, %v2345_v28  ;;  %v1823_v37 = vpop.f32.mrb[8].mxu0  ;;  %v2275_v38 = vpop.f32.mrb[8].mxu1  ;;  %2942 = vmatpush1.bf16.msra.mxu0 %v4907_v6 }
 0x1e6   :  { %v4249_v41 = vadd.f32 %v1823_v37, %v6139_v21  ;;  %v4281_v42 = vadd.f32 %v2275_v38, %v6141_v22  ;;  %v1825_v43 = vpop.f32.mrb[9].mxu0  ;;  %v2277_v44 = vpop.f32.mrb[9].mxu1  ;;  %2943 = vmatprep.subr.bf16.mxu0 %v4912_v12  ;;  %v4963_v12 = vld [vmem:[%s6593_s5 + $0x28] sm:$0xff]   ;;  %v4919_v38 = vld [vmem:[%s6591_s3 + $0x150] ss:$8 sps:$4 sm:$0xff]  }
 0x1e7   :  { %v4250_v45 = vadd.f32 %v1825_v43, %v6145_v23  ;;  %v4282_v46 = vadd.f32 %v2277_v44, %v6147_v24  ;;  %v1827_v47 = vpop.f32.mrb[10].mxu0  ;;  %v2279_v48 = vpop.f32.mrb[10].mxu1  ;;  %2868 = vmatprep.mubr.bf16.mxu0 %v2403_v35  ;;  %4104 = vmatpush3.bf16.msra.mxu1 %v4963_v12  ;;  %v4924_v44 = vld [vmem:[%s6591_s3 + $0x164] ss:$8 sps:$4 sm:$0xff]  }
 0x1e8   :  { %v4251_v50 = vadd.f32 %v1827_v47, %v6139_v21  ;;  %v4283_v51 = vadd.f32 %v2279_v48, %v6141_v22  ;;  %v1829_v52 = vpop.f32.mrb[11].mxu0  ;;  %v2281_v54 = vpop.f32.mrb[11].mxu1  ;;  %2869 = vmatmul.mubr.bf16.gmra.mrb[36].mxu0 %v2402_v32  ;;  %v2350_v61 = vmax.f32 %v4249_v41, 0.0  ;;  %v2352_v62 = vmax.f32 %v4281_v42, 0.0  ;;  %4105 = vmatprep.subr.bf16.mxu1 %v4964_v25 }
 0x1e9   :  { %v4252_v58 = vadd.f32 %v1829_v52, %v6145_v23  ;;  %v4284_v59 = vadd.f32 %v2281_v54, %v6147_v24  ;;  %2944 = vmatpush1.bf16.msra.mxu0 %v4910_v31  ;;  %v2351_v1 = vmax.f32 %v4250_v45, 0.0  ;;  %v2353_v2 = vmax.f32 %v4282_v46, 0.0 }
 0x1ea   :  { %v2354_v63 = vmax.f32 %v4251_v50, 0.0  ;;  %v2356_v0 = vmax.f32 %v4283_v51, 0.0  ;;  %2945 = vmatprep.subr.bf16.mxu0 %v4915_v34 }
 0x1eb   :  { %v2355_v3 = vmax.f32 %v4252_v58, 0.0  ;;  %v2357_v4 = vmax.f32 %v4284_v59, 0.0  ;;  %4106 = vmatpush3.bf16.msra.mxu1 %v4965_v39 }
 0x1ec   :  { %v2406_v5 = vpack.c.bf16 %v2354_v63, %v2350_v61  ;;  %v6238_v6 = vpack.c.bf16 %v2356_v0, %v2352_v62  ;;  %v4927_v62 = vld [vmem:[%s6591_s3 + $0x174] ss:$8 sps:$4 sm:$0xff]  }
 0x1ed   :  { %v2407_v7 = vpack.c.bf16 %v2355_v3, %v2351_v1  ;;  %v6240_v8 = vpack.c.bf16 %v2357_v4, %v2353_v2  ;;  %v1833_v9 = vpop.f32.mrb[12].mxu0  ;;  %v2285_v10 = vpop.f32.mrb[12].mxu1  ;;  %2946 = vmatpush1.bf16.msra.mxu0 %v4913_v49 }
 0x1ee   :  { %v4253_v13 = vadd.f32 %v1833_v9, %v6139_v21  ;;  %v4285_v14 = vadd.f32 %v2285_v10, %v6141_v22  ;;  %v1835_v17 = vpop.f32.mrb[13].mxu0  ;;  %v2287_v18 = vpop.f32.mrb[13].mxu1  ;;  %2947 = vmatprep.subr.bf16.mxu0 %v4918_v55 }
 0x1ef   :  { %v4254_v26 = vadd.f32 %v1835_v17, %v6145_v23  ;;  %v4286_v27 = vadd.f32 %v2287_v18, %v6147_v24  ;;  %v1837_v28 = vpop.f32.mrb[14].mxu0  ;;  %v2289_v29 = vpop.f32.mrb[14].mxu1  ;;  %2878 = vmatprep.mubr.bf16.mxu0 %v2407_v7  ;;  %v4930_v18 = vld [vmem:[%s6591_s3 + $0x184] ss:$8 sps:$4 sm:$0xff]  }
 0x1f0   :  { %v4255_v30 = vadd.f32 %v1837_v28, %v6139_v21  ;;  %v4287_v31 = vadd.f32 %v2289_v29, %v6141_v22  ;;  %v1839_v32 = vpop.f32.mrb[15].mxu0  ;;  %v2291_v34 = vpop.f32.mrb[15].mxu1  ;;  %2879 = vmatmul.mubr.bf16.gmra.mrb[40].mxu0 %v2406_v5  ;;  %v2358_v40 = vmax.f32 %v4253_v13, 0.0  ;;  %v2360_v41 = vmax.f32 %v4285_v14, 0.0 }
 0x1f1   :  { %v4256_v35 = vadd.f32 %v1839_v32, %v6145_v23  ;;  %v4288_v37 = vadd.f32 %v2291_v34, %v6147_v24  ;;  %2948 = vmatpush1.bf16.msra.mxu0 %v4916_v11  ;;  %v2359_v45 = vmax.f32 %v4254_v26, 0.0  ;;  %v2361_v46 = vmax.f32 %v4286_v27, 0.0  ;;  %v4925_v11 = vld [vmem:[%s6591_s3 + $0x170] ss:$8 sps:$4 sm:$0xff]  }
 0x1f2   :  { %v2362_v42 = vmax.f32 %v4255_v30, 0.0  ;;  %v2364_v43 = vmax.f32 %v4287_v31, 0.0  ;;  %2949 = vmatprep.subr.bf16.mxu0 %v4921_v20 }
 0x1f3   :  { %v2363_v47 = vmax.f32 %v4256_v35, 0.0  ;;  %v2365_v48 = vmax.f32 %v4288_v37, 0.0  ;;  %v4928_v35 = vld [vmem:[%s6591_s3 + $0x180] ss:$8 sps:$4 sm:$0xff]  }
 0x1f4   :  { %v2410_v49 = vpack.c.bf16 %v2362_v42, %v2358_v40  ;;  %v6271_v50 = vpack.c.bf16 %v2364_v43, %v2360_v41  ;;  %v4933_v41 = vld [vmem:[%s6591_s3 + $0x194] ss:$8 sps:$4 sm:$0xff]  }
 0x1f5   :  { %v2411_v51 = vpack.c.bf16 %v2363_v47, %v2359_v45  ;;  %v6273_v52 = vpack.c.bf16 %v2365_v48, %v2361_v46  ;;  %v1843_v54 = vpop.f32.mrb[16].mxu0  ;;  %v2295_v55 = vpop.f32.mrb[16].mxu1  ;;  %2950 = vmatpush1.bf16.msra.mxu0 %v4919_v38 }
 0x1f6   :  { %v4257_v58 = vadd.f32 %v1843_v54, %v6139_v21  ;;  %v4289_v59 = vadd.f32 %v2295_v55, %v6141_v22  ;;  %v1845_v60 = vpop.f32.mrb[17].mxu0  ;;  %v2297_v61 = vpop.f32.mrb[17].mxu1  ;;  %2951 = vmatprep.subr.bf16.mxu0 %v4924_v44  ;;  %v4931_v55 = vld [vmem:[%s6591_s3 + $0x190] ss:$8 sps:$4 sm:$0xff]  }
 0x1f7   :  { %v4258_v63 = vadd.f32 %v1845_v60, %v6145_v23  ;;  %v4290_v0 = vadd.f32 %v2297_v61, %v6147_v24  ;;  %v1847_v1 = vpop.f32.mrb[18].mxu0  ;;  %v2299_v2 = vpop.f32.mrb[18].mxu1  ;;  %2888 = vmatprep.mubr.bf16.mxu0 %v2411_v51  ;;  %v4936_v61 = vld [vmem:[%s6591_s3 + $0x1a4] ss:$8 sps:$4 sm:$0xff]  }
 0x1f8   :  { %v4259_v3 = vadd.f32 %v1847_v1, %v6139_v21  ;;  %v4291_v4 = vadd.f32 %v2299_v2, %v6141_v22  ;;  %v1849_v5 = vpop.f32.mrb[19].mxu0  ;;  %v2301_v7 = vpop.f32.mrb[19].mxu1  ;;  %2889 = vmatmul.mubr.bf16.gmra.mrb[44].mxu0 %v2410_v49  ;;  %v2366_v12 = vmax.f32 %v4257_v58, 0.0  ;;  %v2368_v13 = vmax.f32 %v4289_v59, 0.0 }
 0x1f9   :  { %v4260_v9 = vadd.f32 %v1849_v5, %v6145_v23  ;;  %v4292_v10 = vadd.f32 %v2301_v7, %v6147_v24  ;;  %2952 = vmatpush1.bf16.msra.mxu0 %v4922_v56  ;;  %v2367_v20 = vmax.f32 %v4258_v63, 0.0  ;;  %v2369_v25 = vmax.f32 %v4290_v0, 0.0 }
 0x1fa   :  { %v2370_v14 = vmax.f32 %v4259_v3, 0.0  ;;  %v2372_v17 = vmax.f32 %v4291_v4, 0.0  ;;  %2953 = vmatprep.subr.bf16.mxu0 %v4927_v62 }
 0x1fb   :  { %v2371_v26 = vmax.f32 %v4260_v9, 0.0  ;;  %v2373_v27 = vmax.f32 %v4292_v10, 0.0  ;;  %v4934_v10 = vld [vmem:[%s6591_s3 + $0x1a0] ss:$8 sps:$4 sm:$0xff]  }
 0x1fc   :  { %v2414_v28 = vpack.c.bf16 %v2370_v14, %v2366_v12  ;;  %v6295_v29 = vpack.c.bf16 %v2372_v17, %v2368_v13  ;;  %v4939_v17 = vld [vmem:[%s6591_s3 + $0x1b4] ss:$8 sps:$4 sm:$0xff]  }
 0x1fd   :  { %v2415_v30 = vpack.c.bf16 %v2371_v26, %v2367_v20  ;;  %v6297_v31 = vpack.c.bf16 %v2373_v27, %v2369_v25  ;;  %v1853_v32 = vpop.f32.mrb[20].mxu0  ;;  %v2305_v34 = vpop.f32.mrb[20].mxu1  ;;  %2954 = vmatpush1.bf16.msra.mxu0 %v4925_v11 }
 0x1fe   :  { %v4261_v37 = vadd.f32 %v1853_v32, %v6139_v21  ;;  %v4293_v38 = vadd.f32 %v2305_v34, %v6141_v22  ;;  %v1855_v39 = vpop.f32.mrb[21].mxu0  ;;  %v2307_v40 = vpop.f32.mrb[21].mxu1  ;;  %2955 = vmatprep.subr.bf16.mxu0 %v4930_v18 }
 0x1ff   :  { %v4262_v42 = vadd.f32 %v1855_v39, %v6145_v23  ;;  %v4294_v43 = vadd.f32 %v2307_v40, %v6147_v24  ;;  %v1857_v44 = vpop.f32.mrb[22].mxu0  ;;  %v2309_v45 = vpop.f32.mrb[22].mxu1  ;;  %2898 = vmatprep.mubr.bf16.mxu0 %v2415_v30 }
 0x200   :  { %v4263_v46 = vadd.f32 %v1857_v44, %v6139_v21  ;;  %v4295_v47 = vadd.f32 %v2309_v45, %v6141_v22  ;;  %v1859_v48 = vpop.f32.mrb[23].mxu0  ;;  %v2311_v49 = vpop.f32.mrb[23].mxu1  ;;  %2899 = vmatmul.mubr.bf16.gmra.mrb[48].mxu0 %v2414_v28  ;;  %v2374_v56 = vmax.f32 %v4261_v37, 0.0  ;;  %v2376_v58 = vmax.f32 %v4293_v38, 0.0  ;;  %v4937_v37 = vld [vmem:[%s6591_s3 + $0x1b0] ss:$8 sps:$4 sm:$0xff]  }
 0x201   :  { %v4264_v51 = vadd.f32 %v1859_v48, %v6145_v23  ;;  %v4296_v54 = vadd.f32 %v2311_v49, %v6147_v24  ;;  %2956 = vmatpush1.bf16.msra.mxu0 %v4928_v35  ;;  %v2375_v62 = vmax.f32 %v4262_v42, 0.0  ;;  %v2377_v63 = vmax.f32 %v4294_v43, 0.0  ;;  %v4942_v42 = vld [vmem:[%s6591_s3 + $0x1c4] ss:$8 sps:$4 sm:$0xff]  }
 0x202   :  { %v2378_v59 = vmax.f32 %v4263_v46, 0.0  ;;  %v2380_v60 = vmax.f32 %v4295_v47, 0.0  ;;  %2957 = vmatprep.subr.bf16.mxu0 %v4933_v41 }
 0x203   :  { %v2379_v0 = vmax.f32 %v4264_v51, 0.0  ;;  %v2381_v1 = vmax.f32 %v4296_v54, 0.0 }
 0x204   :  { %v2418_v2 = vpack.c.bf16 %v2378_v59, %v2374_v56  ;;  %v6319_v3 = vpack.c.bf16 %v2380_v60, %v2376_v58  ;;  %v4940_v56 = vld [vmem:[%s6591_s3 + $0x1c0] ss:$8 sps:$4 sm:$0xff]  }
 0x205   :  { %v2419_v4 = vpack.c.bf16 %v2379_v0, %v2375_v62  ;;  %v6321_v5 = vpack.c.bf16 %v2381_v1, %v2377_v63  ;;  %v1863_v7 = vpop.f32.mrb[24].mxu0  ;;  %v2315_v9 = vpop.f32.mrb[24].mxu1  ;;  %2958 = vmatpush1.bf16.msra.mxu0 %v4931_v55  ;;  %v4945_v62 = vld [vmem:[%s6591_s3 + $0x1d4] ss:$8 sps:$4 sm:$0xff]  }
 0x206   :  { %v4265_v11 = vadd.f32 %v1863_v7, %v6139_v21  ;;  %v4297_v12 = vadd.f32 %v2315_v9, %v6141_v22  ;;  %v1865_v13 = vpop.f32.mrb[25].mxu0  ;;  %v2317_v14 = vpop.f32.mrb[25].mxu1  ;;  %2959 = vmatprep.subr.bf16.mxu0 %v4936_v61 }
 0x207   :  { %v4266_v18 = vadd.f32 %v1865_v13, %v6145_v23  ;;  %v4298_v20 = vadd.f32 %v2317_v14, %v6147_v24  ;;  %v1867_v25 = vpop.f32.mrb[26].mxu0  ;;  %v2319_v26 = vpop.f32.mrb[26].mxu1  ;;  %2908 = vmatprep.mubr.bf16.mxu0 %v2419_v4  ;;  %v4943_v13 = vld [vmem:[%s6591_s3 + $0x1d0] ss:$8 sps:$4 sm:$0xff]  }
 0x208   :  { %v4267_v27 = vadd.f32 %v1867_v25, %v6139_v21  ;;  %v4299_v28 = vadd.f32 %v2319_v26, %v6141_v22  ;;  %v1869_v30 = vpop.f32.mrb[27].mxu0  ;;  %v2321_v32 = vpop.f32.mrb[27].mxu1  ;;  %2909 = vmatmul.mubr.bf16.gmra.mrb[52].mxu0 %v2418_v2  ;;  %v2382_v38 = vmax.f32 %v4265_v11, 0.0  ;;  %v2384_v39 = vmax.f32 %v4297_v12, 0.0 }
 0x209   :  { %v4268_v34 = vadd.f32 %v1869_v30, %v6145_v23  ;;  %v4300_v35 = vadd.f32 %v2321_v32, %v6147_v24  ;;  %2960 = vmatpush1.bf16.msra.mxu0 %v4934_v10  ;;  %v2383_v43 = vmax.f32 %v4266_v18, 0.0  ;;  %v2385_v44 = vmax.f32 %v4298_v20, 0.0  ;;  %v4946_v32 = vld [vmem:[%s6591_s3 + $0x1e0] ss:$8 sps:$4 sm:$0xff]  }
 0x20a   :  { %v2386_v40 = vmax.f32 %v4267_v27, 0.0  ;;  %v2388_v41 = vmax.f32 %v4299_v28, 0.0  ;;  %2961 = vmatprep.subr.bf16.mxu0 %v4939_v17 }
 0x20b   :  { %v2387_v45 = vmax.f32 %v4268_v34, 0.0  ;;  %v2389_v46 = vmax.f32 %v4300_v35, 0.0  ;;  %v4951_v34 = vld [vmem:[%s6591_s3 + $0x1f4] ss:$8 sps:$4 sm:$0xff]   ;;  %v4949_v35 = vld [vmem:[%s6591_s3 + $0x1f0] ss:$8 sps:$4 sm:$0xff]  }
 0x20c   :  { %v2422_v47 = vpack.c.bf16 %v2386_v40, %v2382_v38  ;;  %v6343_v48 = vpack.c.bf16 %v2388_v41, %v2384_v39 }
 0x20d   :  { %v2423_v49 = vpack.c.bf16 %v2387_v45, %v2383_v43  ;;  %v2425_v51 = vpack.c.bf16 %v2389_v46, %v2385_v44  ;;  %v1873_v54 = vpop.f32.mrb[28].mxu0  ;;  %v2325_v55 = vpop.f32.mrb[28].mxu1  ;;  %2962 = vmatpush1.bf16.msra.mxu0 %v4937_v37  ;;  %v4969_v45 = vld [vmem:[%s6594_s7 + $0x8] sm:$0xff]  }
 0x20e   :  { %v4269_v58 = vadd.f32 %v1873_v54, %v6139_v21  ;;  %v4301_v59 = vadd.f32 %v2325_v55, %v6141_v22  ;;  %v1875_v60 = vpop.f32.mrb[29].mxu0  ;;  %v2327_v61 = vpop.f32.mrb[29].mxu1  ;;  %2963 = vmatprep.subr.bf16.mxu0 %v4942_v42 }
 0x20f   :  { %v4270_v63 = vadd.f32 %v1875_v60, %v6145_v23  ;;  %v4302_v0 = vadd.f32 %v2327_v61, %v6147_v24  ;;  %v1877_v1 = vpop.f32.mrb[30].mxu0  ;;  %v2329_v2 = vpop.f32.mrb[30].mxu1  ;;  %2918 = vmatprep.mubr.bf16.mxu0 %v2423_v49 }
 0x210   :  { %v4271_v4 = vadd.f32 %v1877_v1, %v6139_v21  ;;  %v4303_v7 = vadd.f32 %v2329_v2, %v6141_v22  ;;  %v1879_v9 = vpop.f32.mrb[31].mxu0  ;;  %v2331_v10 = vpop.f32.mrb[31].mxu1  ;;  %2919 = vmatmul.mubr.bf16.gmra.mrb[56].mxu0 %v2422_v47  ;;  %v2390_v14 = vmax.f32 %v4269_v58, 0.0  ;;  %v2392_v17 = vmax.f32 %v4301_v59, 0.0  ;;  %v4948_v21 = vld [vmem:[%s6591_s3 + $0x1e4] ss:$8 sps:$4 sm:$0xff]  }
 0x211   :  { %v4272_v11 = vadd.f32 %v1879_v9, %v6145_v23  ;;  %v4304_v12 = vadd.f32 %v2331_v10, %v6147_v24  ;;  %2964 = vmatpush1.bf16.msra.mxu0 %v4940_v56  ;;  %v2391_v22 = vmax.f32 %v4270_v63, 0.0  ;;  %v2393_v25 = vmax.f32 %v4302_v0, 0.0  ;;  %v4970_v56 = vld [vmem:[%s6594_s7 + $0x10] sm:$0xff]  }
 0x212   :  { %v2394_v18 = vmax.f32 %v4271_v4, 0.0  ;;  %v2396_v20 = vmax.f32 %v4303_v7, 0.0  ;;  %2965 = vmatprep.subr.bf16.mxu0 %v4945_v62 }
 0x213   :  { %v2395_v26 = vmax.f32 %v4272_v11, 0.0  ;;  %v2397_v23 = vmax.f32 %v4304_v12, 0.0 }
 0x214   :  { %v2426_v27 = vpack.c.bf16 %v2394_v18, %v2390_v14  ;;  %v2428_v24 = vpack.c.bf16 %v2396_v20, %v2392_v17 }
 0x215   :  { %v2427_v28 = vpack.c.bf16 %v2395_v26, %v2391_v22  ;;  %v2429_v30 = vpack.c.bf16 %v2397_v23, %v2393_v25  ;;  %2966 = vmatpush1.bf16.msra.mxu0 %v4943_v13 }
 0x216   :  { %2967 = vmatprep.subr.bf16.mxu0 %v4948_v21 }
 0x217   :  { %2928 = vmatprep.mubr.bf16.mxu0 %v2427_v28 }
 0x218   :  { %2929 = vmatmul.mubr.bf16.gmra.mrb[60].mxu0 %v2426_v27 }
 0x219   :  { %2968 = vmatpush1.bf16.msra.mxu0 %v4946_v32  ;;  %2971 = vmatprep.mubr.bf16.mxu0 %v6174_v57  ;;  %v4967_v57 = vld [vmem:[%s6593_s5 + $0x38] sm:$0xff]  }
 0x21a   :  { %2969 = vmatprep.subr.bf16.mxu0 %v4951_v34 }
 0x21d   :  { %2970 = vmatpush1.bf16.msra.mxu0 %v4949_v35 }
 0x220   :  { %2972 = vmatmul.mubr.bf16.vlgmr.msra.gmra.mrb[32].mxu0 %v6166_v53  ;;  %v4966_v53 = vld [vmem:[%s6593_s5 + $0x78] sm:$0xff]  }
 0x221   :  { %2981 = vmatprep.mubr.bf16.mxu0 %v6210_v36  ;;  %4107 = vmatprep.subr.bf16.mxu1 %v4966_v53  ;;  %v2494_v36 = vld [vmem:[%s6595_s4] sm:$0x3] }
 0x222   :  { %4108 = vmatpush3.bf16.msra.mxu1 %v4967_v57 }
 0x228   :  { %2982 = vmatmul.mubr.bf16.gmra.mrb[36].mxu0 %v6205_v33  ;;  %v4968_v33 = vld [vmem:[%s6594_s7] sm:$0xff]  }
 0x229   :  { %2991 = vmatprep.mubr.bf16.mxu0 %v6240_v8  ;;  %4185 = vmatprep.subr.bf16.mxu1 %v4968_v33  ;;  %v6405_v8 = vrot.slane %v2494_v36, %v411_v19 }
 0x230   :  { %2992 = vmatmul.mubr.bf16.gmra.mrb[40].mxu0 %v6238_v6  ;;  %v6401_v6 = vrot.slane %v2494_v36, %v407_v16 }
 0x231   :  { %3001 = vmatprep.mubr.bf16.mxu0 %v6273_v52 }
 0x238   :  { %3002 = vmatmul.mubr.bf16.gmra.mrb[44].mxu0 %v6271_v50 }
 0x239   :  { %3011 = vmatprep.mubr.bf16.mxu0 %v6297_v31 }
 0x240   :  { %3012 = vmatmul.mubr.bf16.gmra.mrb[48].mxu0 %v6295_v29 }
 0x241   :  { %3021 = vmatprep.mubr.bf16.mxu0 %v6321_v5 }
 0x248   :  { %3022 = vmatmul.mubr.bf16.gmra.mrb[52].mxu0 %v6319_v3 }
 0x249   :  { %3031 = vmatprep.mubr.bf16.mxu0 %v2425_v51 }
 0x250   :  { %3032 = vmatmul.mubr.bf16.gmra.mrb[56].mxu0 %v6343_v48 }
 0x251   :  { %3041 = vmatprep.mubr.bf16.mxu0 %v2429_v30 }
 0x258   :  { %3042 = vmatmul.mubr.bf16.gmra.mrb[60].mxu0 %v2428_v24 }
 0x2f3   :  { %v2973_v50 = vpop.f32.mrb[32].mxu0 }
 0x2f4   :  { %v4305_v52 = vadd.f32 %v2973_v50, %v6401_v6  ;;  %v2975_v29 = vpop.f32.mrb[33].mxu0 }
 0x2f5   :  { %v4306_v31 = vadd.f32 %v2975_v29, %v6405_v8  ;;  %v2977_v3 = vpop.f32.mrb[34].mxu0 }
 0x2f6   :  { %v4307_v5 = vadd.f32 %v2977_v3, %v6401_v6  ;;  %v2979_v37 = vpop.f32.mrb[35].mxu0  ;;  %v3052_v39 = vmax.f32 %v4305_v52, 0.0 }
 0x2f7   :  { %v4308_v38 = vadd.f32 %v2979_v37, %v6405_v8  ;;  %v3053_v16 = vmax.f32 %v4306_v31, 0.0 }
 0x2f8   :  { %v3054_v40 = vmax.f32 %v4307_v5, 0.0 }
 0x2f9   :  { %v3055_v41 = vmax.f32 %v4308_v38, 0.0 }
 0x2fa   :  { %v3084_v42 = vpack.c.bf16 %v3054_v40, %v3052_v39 }
 0x2fb   :  { %v3085_v15 = vpack.c.bf16 %v3055_v41, %v3053_v16  ;;  %v2983_v19 = vpop.f32.mrb[36].mxu0 }
 0x2fc   :  { %v4309_v43 = vadd.f32 %v2983_v19, %v6401_v6  ;;  %v2985_v44 = vpop.f32.mrb[37].mxu0 }
 0x2fd   :  { %v4310_v46 = vadd.f32 %v2985_v44, %v6405_v8  ;;  %v2987_v47 = vpop.f32.mrb[38].mxu0  ;;  %3267 = vmatprep.mubr.bf16.mxu1 %v3085_v15 }
 0x2fe   :  { %v4311_v48 = vadd.f32 %v2987_v47, %v6401_v6  ;;  %v2989_v49 = vpop.f32.mrb[39].mxu0  ;;  %3268 = vmatmul.mubr.bf16.vlgmr.msra.gmra.mrb[32].mxu1 %v3084_v42  ;;  %v3056_v54 = vmax.f32 %v4309_v43, 0.0 }
 0x2ff   :  { %v4312_v51 = vadd.f32 %v2989_v49, %v6405_v8  ;;  %4186 = vmatpush3.bf16.msra.mxu1 %v4968_v33  ;;  %v3057_v58 = vmax.f32 %v4310_v46, 0.0 }
 0x300   :  { %v3058_v55 = vmax.f32 %v4311_v48, 0.0  ;;  %4187 = vmatprep.subr.bf16.mxu1 %v4969_v45 }
 0x301   :  { %v3059_v59 = vmax.f32 %v4312_v51, 0.0 }
 0x302   :  { %v3086_v60 = vpack.c.bf16 %v3058_v55, %v3056_v54 }
 0x303   :  { %v3087_v61 = vpack.c.bf16 %v3059_v59, %v3057_v58  ;;  %v2993_v62 = vpop.f32.mrb[40].mxu0  ;;  %4188 = vmatpush3.bf16.msra.mxu1 %v4969_v45 }
 0x304   :  { %v4313_v63 = vadd.f32 %v2993_v62, %v6401_v6  ;;  %v2995_v0 = vpop.f32.mrb[41].mxu0  ;;  %4189 = vmatprep.subr.bf16.mxu1 %v4970_v56 }
 0x305   :  { %v4314_v1 = vadd.f32 %v2995_v0, %v6405_v8  ;;  %v2997_v2 = vpop.f32.mrb[42].mxu0  ;;  %3275 = vmatprep.mubr.bf16.mxu1 %v3087_v61 }
 0x306   :  { %v4315_v4 = vadd.f32 %v2997_v2, %v6401_v6  ;;  %v2999_v7 = vpop.f32.mrb[43].mxu0  ;;  %3276 = vmatmul.mubr.bf16.gmra.mrb[36].mxu1 %v3086_v60  ;;  %v3060_v10 = vmax.f32 %v4313_v63, 0.0 }
 0x307   :  { %v4316_v9 = vadd.f32 %v2999_v7, %v6405_v8  ;;  %4190 = vmatpush3.bf16.msra.mxu1 %v4970_v56  ;;  %v3061_v12 = vmax.f32 %v4314_v1, 0.0 }
 0x308   :  { %v3062_v11 = vmax.f32 %v4315_v4, 0.0 }
 0x309   :  { %v3063_v13 = vmax.f32 %v4316_v9, 0.0 }
 0x30a   :  { %v3088_v14 = vpack.c.bf16 %v3062_v11, %v3060_v10 }
 0x30b   :  { %v3089_v17 = vpack.c.bf16 %v3063_v13, %v3061_v12  ;;  %v3003_v18 = vpop.f32.mrb[44].mxu0 }
 0x30c   :  { %v4317_v20 = vadd.f32 %v3003_v18, %v6401_v6  ;;  %v3005_v21 = vpop.f32.mrb[45].mxu0 }
 0x30d   :  { %v4318_v22 = vadd.f32 %v3005_v21, %v6405_v8  ;;  %v3007_v25 = vpop.f32.mrb[46].mxu0  ;;  %3283 = vmatprep.mubr.bf16.mxu1 %v3089_v17 }
 0x30e   :  { %v4319_v26 = vadd.f32 %v3007_v25, %v6401_v6  ;;  %v3009_v23 = vpop.f32.mrb[47].mxu0  ;;  %3284 = vmatmul.mubr.bf16.gmra.mrb[40].mxu1 %v3088_v14  ;;  %v3064_v24 = vmax.f32 %v4317_v20, 0.0 }
 0x30f   :  { %v4320_v27 = vadd.f32 %v3009_v23, %v6405_v8  ;;  %v3065_v30 = vmax.f32 %v4318_v22, 0.0 }
 0x310   :  { %v3066_v28 = vmax.f32 %v4319_v26, 0.0 }
 0x311   :  { %v3067_v32 = vmax.f32 %v4320_v27, 0.0 }
 0x312   :  { %v3090_v34 = vpack.c.bf16 %v3066_v28, %v3064_v24  ;;  %v4971_v24 = vld [vmem:[%s6594_s7 + $0x18] sm:$0xff]   ;;  %v4974_v28 = vld [vmem:[%s6594_s7 + $0x30] sm:$0xff]  }
 0x313   :  { %v3091_v35 = vpack.c.bf16 %v3067_v32, %v3065_v30  ;;  %v3013_v53 = vpop.f32.mrb[48].mxu0  ;;  %4191 = vmatprep.subr.bf16.mxu1 %v4971_v24  ;;  %v4975_v30 = vld [vmem:[%s6594_s7 + $0x38] sm:$0xff]  }
 0x314   :  { %v4321_v57 = vadd.f32 %v3013_v53, %v6401_v6  ;;  %v3015_v33 = vpop.f32.mrb[49].mxu0  ;;  %4192 = vmatpush3.bf16.msra.mxu1 %v4971_v24 }
 0x315   :  { %v4322_v36 = vadd.f32 %v3015_v33, %v6405_v8  ;;  %v3017_v50 = vpop.f32.mrb[50].mxu0  ;;  %3291 = vmatprep.mubr.bf16.mxu1 %v3091_v35 }
 0x316   :  { %v4323_v52 = vadd.f32 %v3017_v50, %v6401_v6  ;;  %v3019_v29 = vpop.f32.mrb[51].mxu0  ;;  %3292 = vmatmul.mubr.bf16.gmra.mrb[44].mxu1 %v3090_v34  ;;  %v3068_v3 = vmax.f32 %v4321_v57, 0.0  ;;  %v6463_v34 = vld [vmem:[%s6596_s6] ss:$0 sm:$0xff] }
 0x317   :  { %v4324_v31 = vadd.f32 %v3019_v29, %v6405_v8  ;;  %v3069_v37 = vmax.f32 %v4322_v36, 0.0 }
 0x318   :  { %v3070_v5 = vmax.f32 %v4323_v52, 0.0 }
 0x319   :  { %v3071_v38 = vmax.f32 %v4324_v31, 0.0 }
 0x31a   :  { %v3092_v39 = vpack.c.bf16 %v3070_v5, %v3068_v3 }
 0x31b   :  { %v3093_v40 = vpack.c.bf16 %v3071_v38, %v3069_v37  ;;  %v3023_v16 = vpop.f32.mrb[52].mxu0 }
 0x31c   :  { %v4325_v41 = vadd.f32 %v3023_v16, %v6401_v6  ;;  %v3025_v42 = vpop.f32.mrb[53].mxu0 }
 0x31d   :  { %v4326_v15 = vadd.f32 %v3025_v42, %v6405_v8  ;;  %v3027_v19 = vpop.f32.mrb[54].mxu0  ;;  %3299 = vmatprep.mubr.bf16.mxu1 %v3093_v40 }
 0x31e   :  { %v4327_v43 = vadd.f32 %v3027_v19, %v6401_v6  ;;  %v3029_v44 = vpop.f32.mrb[55].mxu0  ;;  %3300 = vmatmul.mubr.bf16.gmra.mrb[48].mxu1 %v3092_v39  ;;  %v3072_v46 = vmax.f32 %v4325_v41, 0.0 }
 0x31f   :  { %v4328_v45 = vadd.f32 %v3029_v44, %v6405_v8  ;;  %v3073_v48 = vmax.f32 %v4326_v15, 0.0 }
 0x320   :  { %v3074_v47 = vmax.f32 %v4327_v43, 0.0 }
 0x321   :  { %v3075_v49 = vmax.f32 %v4328_v45, 0.0 }
 0x322   :  { %v3094_v51 = vpack.c.bf16 %v3074_v47, %v3072_v46 }
 0x323   :  { %v3095_v54 = vpack.c.bf16 %v3075_v49, %v3073_v48  ;;  %v3033_v55 = vpop.f32.mrb[56].mxu0 }
 0x324   :  { %v4329_v56 = vadd.f32 %v3033_v55, %v6401_v6  ;;  %v3035_v58 = vpop.f32.mrb[57].mxu0 }
 0x325   :  { %v4330_v59 = vadd.f32 %v3035_v58, %v6405_v8  ;;  %v3037_v60 = vpop.f32.mrb[58].mxu0  ;;  %3307 = vmatprep.mubr.bf16.mxu1 %v3095_v54 }
 0x326   :  { %v4331_v61 = vadd.f32 %v3037_v60, %v6401_v6  ;;  %v3039_v62 = vpop.f32.mrb[59].mxu0  ;;  %3308 = vmatmul.mubr.bf16.gmra.mrb[52].mxu1 %v3094_v51  ;;  %v3076_v0 = vmax.f32 %v4329_v56, 0.0 }
 0x327   :  { %v4332_v63 = vadd.f32 %v3039_v62, %v6405_v8  ;;  %v3077_v2 = vmax.f32 %v4330_v59, 0.0 }
 0x328   :  { %v3078_v1 = vmax.f32 %v4331_v61, 0.0 }
 0x329   :  { %v3079_v4 = vmax.f32 %v4332_v63, 0.0 }
 0x32a   :  { %v3096_v7 = vpack.c.bf16 %v3078_v1, %v3076_v0 }
 0x32b   :  { %v3097_v9 = vpack.c.bf16 %v3079_v4, %v3077_v2  ;;  %v3043_v10 = vpop.f32.mrb[60].mxu0 }
 0x32c   :  { %v4333_v11 = vadd.f32 %v3043_v10, %v6401_v6  ;;  %v3045_v12 = vpop.f32.mrb[61].mxu0 }
 0x32d   :  { %v4334_v13 = vadd.f32 %v3045_v12, %v6405_v8  ;;  %v3047_v14 = vpop.f32.mrb[62].mxu0  ;;  %3315 = vmatprep.mubr.bf16.mxu1 %v3097_v9 }
 0x32e   :  { %v4335_v17 = vadd.f32 %v3047_v14, %v6401_v6  ;;  %v3049_v18 = vpop.f32.mrb[63].mxu0  ;;  %3316 = vmatmul.mubr.bf16.gmra.mrb[56].mxu1 %v3096_v7  ;;  %v3080_v21 = vmax.f32 %v4333_v11, 0.0  ;;  %v4972_v6 = vld [vmem:[%s6594_s7 + $0x20] sm:$0xff]  }
 0x32f   :  { %v4336_v20 = vadd.f32 %v3049_v18, %v6405_v8  ;;  %v3081_v25 = vmax.f32 %v4334_v13, 0.0  ;;  %4193 = vmatprep.subr.bf16.mxu1 %v4972_v6  ;;  %v4973_v8 = vld [vmem:[%s6594_s7 + $0x28] sm:$0xff]  }
 0x330   :  { %v3082_v22 = vmax.f32 %v4335_v17, 0.0  ;;  %4194 = vmatpush3.bf16.msra.mxu1 %v4972_v6 }
 0x331   :  { %v3083_v26 = vmax.f32 %v4336_v20, 0.0  ;;  %4195 = vmatprep.subr.bf16.mxu1 %v4973_v8 }
 0x332   :  { %v3098_v23 = vpack.c.bf16 %v3082_v22, %v3080_v21 }
 0x333   :  { %v3099_v27 = vpack.c.bf16 %v3083_v26, %v3081_v25 }
 0x334   :  { %4196 = vmatpush3.bf16.msra.mxu1 %v4973_v8 }
 0x335   :  { %3323 = vmatprep.mubr.bf16.mxu1 %v3099_v27  ;;  %4197 = vmatprep.subr.bf16.mxu1 %v4974_v28 }
 0x336   :  { %3324 = vmatmul.mubr.bf16.gmra.mrb[60].mxu1 %v3098_v23 }
 0x338   :  { %4198 = vmatpush3.bf16.msra.mxu1 %v4974_v28 }
 0x339   :  { %4199 = vmatprep.subr.bf16.mxu1 %v4975_v30 }
 0x33c   :  { %4200 = vmatpush3.bf16.msra.mxu1 %v4975_v30 }
 0x3d1   :  { %v4109_v32 = vpop.f32.mrb[32].mxu1 }
 0x3d2   :  { %v4110_v35 = vpop.f32.mrb[33].mxu1 }
 0x3d3   :  { %v4111_v53 = vadd.f32 %v4110_v35, %v4109_v32  ;;  %v4112_v57 = vpop.f32.mrb[34].mxu1 }
 0x3d4   :  { %v4113_v33 = vpop.f32.mrb[35].mxu1 }
 0x3d5   :  { %v3270_v36 = vadd.f32 %v4111_v53, %v6463_v34  ;;  %v4114_v50 = vadd.f32 %v4113_v33, %v4112_v57 }
 0x3d7   :  { %v3273_v52 = vadd.f32 %v4114_v50, %v6463_v34  ;;  %v3332_v29 = vmax.f32 %v3270_v36, 0.0 }
 0x3d9   :  { %v3333_v31 = vmax.f32 %v3273_v52, 0.0  ;;  %v4115_v3 = vpop.f32.mrb[36].mxu1 }
 0x3da   :  { %v4116_v5 = vpop.f32.mrb[37].mxu1 }
 0x3db   :  { %v4117_v37 = vadd.f32 %v4116_v5, %v4115_v3  ;;  %v4118_v38 = vpop.f32.mrb[38].mxu1  ;;  %v3348_v39 = vpack.c.bf16 %v3333_v31, %v3332_v29 }
 0x3dc   :  { %v4119_v40 = vpop.f32.mrb[39].mxu1 }
 0x3dd   :  { %v3278_v16 = vadd.f32 %v4117_v37, %v6463_v34  ;;  %v4120_v41 = vadd.f32 %v4119_v40, %v4118_v38  ;;  %4201 = vmatprep.mubr.bf16.mxu1 %v3348_v39 }
 0x3df   :  { %v3281_v42 = vadd.f32 %v4120_v41, %v6463_v34  ;;  %v3334_v15 = vmax.f32 %v3278_v16, 0.0 }
 0x3e1   :  { %v3335_v19 = vmax.f32 %v3281_v42, 0.0  ;;  %v4121_v43 = vpop.f32.mrb[40].mxu1 }
 0x3e2   :  { %v4122_v44 = vpop.f32.mrb[41].mxu1 }
 0x3e3   :  { %v3349_v45 = vpack.c.bf16 %v3335_v19, %v3334_v15  ;;  %v4123_v46 = vadd.f32 %v4122_v44, %v4121_v43  ;;  %v4124_v47 = vpop.f32.mrb[42].mxu1 }
 0x3e4   :  { %v4125_v48 = vpop.f32.mrb[43].mxu1 }
 0x3e5   :  { %v3286_v49 = vadd.f32 %v4123_v46, %v6463_v34  ;;  %v4126_v51 = vadd.f32 %v4125_v48, %v4124_v47  ;;  %4202 = vmatmul.mubr.bf16.vlgmr.msra.gmra.mrb[64].mxu1 %v3349_v45  ;;  %v4976_v47 = vld [vmem:[%s6597_s9] sm:$0xff]   ;;  %v4977_v48 = vld [vmem:[%s6597_s9 + $0x8] sm:$0xff]  }
 0x3e6   :  { %4217 = vmatprep.subr.bf16.mxu1 %v4976_v47 }
 0x3e7   :  { %v3289_v54 = vadd.f32 %v4126_v51, %v6463_v34  ;;  %v3336_v55 = vmax.f32 %v3286_v49, 0.0  ;;  %4218 = vmatpush3.bf16.msra.mxu1 %v4976_v47  ;;  %v4979_v49 = vld [vmem:[%s6597_s9 + $0x18] sm:$0xff]   ;;  %v6496_v51 = vld [vmem:[%s6598_s8] ss:$0 sm:$0xff] }
 0x3e8   :  { %4219 = vmatprep.subr.bf16.mxu1 %v4977_v48 }
 0x3e9   :  { %v3337_v56 = vmax.f32 %v3289_v54, 0.0  ;;  %v4127_v58 = vpop.f32.mrb[44].mxu1 }
 0x3ea   :  { %v4128_v59 = vpop.f32.mrb[45].mxu1 }
 0x3eb   :  { %v4129_v60 = vadd.f32 %v4128_v59, %v4127_v58  ;;  %v4130_v61 = vpop.f32.mrb[46].mxu1  ;;  %v3350_v62 = vpack.c.bf16 %v3337_v56, %v3336_v55  ;;  %4220 = vmatpush3.bf16.msra.mxu1 %v4977_v48 }
 0x3ec   :  { %v4131_v63 = vpop.f32.mrb[47].mxu1 }
 0x3ed   :  { %v3294_v0 = vadd.f32 %v4129_v60, %v6463_v34  ;;  %v4132_v1 = vadd.f32 %v4131_v63, %v4130_v61  ;;  %4205 = vmatprep.mubr.bf16.mxu1 %v3350_v62 }
 0x3ef   :  { %v3297_v2 = vadd.f32 %v4132_v1, %v6463_v34  ;;  %v3338_v4 = vmax.f32 %v3294_v0, 0.0 }
 0x3f1   :  { %v3339_v7 = vmax.f32 %v3297_v2, 0.0  ;;  %v4133_v9 = vpop.f32.mrb[48].mxu1 }
 0x3f2   :  { %v4134_v10 = vpop.f32.mrb[49].mxu1 }
 0x3f3   :  { %v4135_v11 = vadd.f32 %v4134_v10, %v4133_v9  ;;  %v4136_v12 = vpop.f32.mrb[50].mxu1  ;;  %v3351_v13 = vpack.c.bf16 %v3339_v7, %v3338_v4 }
 0x3f4   :  { %v4137_v14 = vpop.f32.mrb[51].mxu1 }
 0x3f5   :  { %v3302_v17 = vadd.f32 %v4135_v11, %v6463_v34  ;;  %v4138_v18 = vadd.f32 %v4137_v14, %v4136_v12  ;;  %4206 = vmatmul.mubr.bf16.gmra.mrb[68].mxu1 %v3351_v13 }
 0x3f7   :  { %v3305_v20 = vadd.f32 %v4138_v18, %v6463_v34  ;;  %v3340_v21 = vmax.f32 %v3302_v17, 0.0 }
 0x3f9   :  { %v3341_v22 = vmax.f32 %v3305_v20, 0.0  ;;  %v4139_v25 = vpop.f32.mrb[52].mxu1 }
 0x3fa   :  { %v4140_v26 = vpop.f32.mrb[53].mxu1 }
 0x3fb   :  { %v4141_v23 = vadd.f32 %v4140_v26, %v4139_v25  ;;  %v4142_v27 = vpop.f32.mrb[54].mxu1  ;;  %v3352_v24 = vpack.c.bf16 %v3341_v22, %v3340_v21 }
 0x3fc   :  { %v4143_v6 = vpop.f32.mrb[55].mxu1 }
 0x3fd   :  { %v3310_v8 = vadd.f32 %v4141_v23, %v6463_v34  ;;  %v4144_v28 = vadd.f32 %v4143_v6, %v4142_v27  ;;  %4209 = vmatprep.mubr.bf16.mxu1 %v3352_v24 }
 0x3ff   :  { %v3313_v30 = vadd.f32 %v4144_v28, %v6463_v34  ;;  %v3342_v32 = vmax.f32 %v3310_v8, 0.0 }
 0x401   :  { %v3343_v35 = vmax.f32 %v3313_v30, 0.0  ;;  %v4145_v53 = vpop.f32.mrb[56].mxu1 }
 0x402   :  { %v4146_v57 = vpop.f32.mrb[57].mxu1 }
 0x403   :  { %v4147_v33 = vadd.f32 %v4146_v57, %v4145_v53  ;;  %v4148_v36 = vpop.f32.mrb[58].mxu1  ;;  %v3353_v50 = vpack.c.bf16 %v3343_v35, %v3342_v32 }
 0x404   :  { %v4149_v52 = vpop.f32.mrb[59].mxu1 }
 0x405   :  { %v3318_v29 = vadd.f32 %v4147_v33, %v6463_v34  ;;  %v4150_v31 = vadd.f32 %v4149_v52, %v4148_v36  ;;  %4210 = vmatmul.mubr.bf16.gmra.mrb[72].mxu1 %v3353_v50 }
 0x407   :  { %v3321_v3 = vadd.f32 %v4150_v31, %v6463_v34  ;;  %v3344_v5 = vmax.f32 %v3318_v29, 0.0 }
 0x409   :  { %v3345_v37 = vmax.f32 %v3321_v3, 0.0  ;;  %v4151_v38 = vpop.f32.mrb[60].mxu1 }
 0x40a   :  { %v4152_v39 = vpop.f32.mrb[61].mxu1 }
 0x40b   :  { %v4153_v40 = vadd.f32 %v4152_v39, %v4151_v38  ;;  %v4154_v16 = vpop.f32.mrb[62].mxu1  ;;  %v3354_v41 = vpack.c.bf16 %v3345_v37, %v3344_v5 }
 0x40c   :  { %v4155_v42 = vpop.f32.mrb[63].mxu1 }
 0x40d   :  { %v3326_v15 = vadd.f32 %v4153_v40, %v6463_v34  ;;  %v4156_v19 = vadd.f32 %v4155_v42, %v4154_v16  ;;  %4213 = vmatprep.mubr.bf16.mxu1 %v3354_v41 }
 0x40f   :  { %v3329_v43 = vadd.f32 %v4156_v19, %v6463_v34  ;;  %v3346_v44 = vmax.f32 %v3326_v15, 0.0  ;;  %v4978_v34 = vld [vmem:[%s6597_s9 + $0x10] sm:$0xff]  }
 0x410   :  { %4221 = vmatprep.subr.bf16.mxu1 %v4978_v34 }
 0x411   :  { %v3347_v45 = vmax.f32 %v3329_v43, 0.0  ;;  %4222 = vmatpush3.bf16.msra.mxu1 %v4978_v34 }
 0x412   :  { %4223 = vmatprep.subr.bf16.mxu1 %v4979_v49 }
 0x413   :  { %v3355_v46 = vpack.c.bf16 %v3347_v45, %v3346_v44 }
 0x415   :  { %4214 = vmatmul.mubr.bf16.gmra.mrb[76].mxu1 %v3355_v46 }
 0x416   :  { %4224 = vmatpush3.bf16.msra.mxu1 %v4979_v49 }
 0x4b8   :  { %v4203_v54 = vpop.f32.mrb[64].mxu1 }
 0x4b9   :  { %v3470_v55 = vadd.f32 %v4203_v54, %v6496_v51  ;;  %v3461_v56 = vpop.f32.mrb[65].mxu1 }
 0x4ba   :  { %v3462_v58 = vadd.f32 %v6496_v51, %v3461_v56  ;;  %v4204_v59 = vpop.f32.mrb[66].mxu1 }
 0x4bb   :  { %v3526_v60 = vmul.f32 0.5, %v3470_v55  ;;  %v3473_v61 = vadd.f32 %v4204_v59, %v6496_v51  ;;  %v3464_v62 = vpop.f32.mrb[67].mxu1 }
 0x4bc   :  { %v3524_v63 = vmul.f32 0.5, %v3462_v58  ;;  %v3465_v0 = vadd.f32 %v6496_v51, %v3464_v62 }
 0x4bd   :  { %4980 = vtanh.f32 %v3526_v60  ;;  %v3527_v1 = vmul.f32 0.5, %v3473_v61 }
 0x4be   :  { %4982 = vtanh.f32 %v3524_v63  ;;  %v3525_v2 = vmul.f32 0.5, %v3465_v0 }
 0x4bf   :  { %4984 = vtanh.f32 %v3527_v1 }
 0x4c0   :  { %4986 = vtanh.f32 %v3525_v2 }
 0x4c7   :  { %v4981_v4 = vpop.eup %4980 }
 0x4c8   :  { %v4983_v7 = vpop.eup %4982  ;;  %v3558_v9 = vmul.f32 0.5, %v4981_v4  ;;  %v4207_v10 = vpop.f32.mrb[68].mxu1 }
 0x4c9   :  { %v4985_v11 = vpop.eup %4984  ;;  %v3556_v12 = vmul.f32 0.5, %v4983_v7  ;;  %v3486_v13 = vadd.f32 %v4207_v10, %v6496_v51  ;;  %v3477_v14 = vpop.f32.mrb[69].mxu1 }
 0x4ca   :  { %v4987_v17 = vpop.eup %4986  ;;  %v3559_v18 = vmul.f32 0.5, %v4985_v11  ;;  %v3478_v20 = vadd.f32 %v6496_v51, %v3477_v14  ;;  %v4208_v21 = vpop.f32.mrb[70].mxu1  ;;  %v3574_v27 = vadd.f32 0.5, %v3558_v9 }
 0x4cb   :  { %v3557_v22 = vmul.f32 0.5, %v4987_v17  ;;  %v3530_v25 = vmul.f32 0.5, %v3486_v13  ;;  %v3489_v26 = vadd.f32 %v4208_v21, %v6496_v51  ;;  %v3480_v23 = vpop.f32.mrb[71].mxu1  ;;  %v3572_v28 = vadd.f32 0.5, %v3556_v12 }
 0x4cc   :  { %v3575_v24 = vadd.f32 0.5, %v3559_v18  ;;  %v3528_v6 = vmul.f32 0.5, %v3478_v20  ;;  %v3481_v8 = vadd.f32 %v6496_v51, %v3480_v23 }
 0x4cd   :  { %v3573_v30 = vadd.f32 0.5, %v3557_v22  ;;  %4988 = vtanh.f32 %v3530_v25  ;;  %v3531_v32 = vmul.f32 0.5, %v3489_v26 }
 0x4ce   :  { %v3589_v35 = vpack.c.bf16 %v3575_v24, %v3574_v27  ;;  %4990 = vtanh.f32 %v3528_v6  ;;  %v3529_v53 = vmul.f32 0.5, %v3481_v8 }
 0x4cf   :  { %v3588_v57 = vpack.c.bf16 %v3573_v30, %v3572_v28  ;;  %4992 = vtanh.f32 %v3531_v32 }
 0x4d0   :  { %4994 = vtanh.f32 %v3529_v53 }
 0x4d1   :  { %4225 = vmatprep.mubr.msk.bf16.mxu1 %vm3635_vm1, %v3588_v57 }
 0x4d2   :  { %4226 = vmatmul.mubr.msk.bf16.vlgmr.msra.gmra.mrb[80].mxu1 %vm3635_vm1, %v3589_v35 }
 0x4d7   :  { %v4989_v33 = vpop.eup %4988 }
 0x4d8   :  { %v4991_v36 = vpop.eup %4990  ;;  %v3562_v50 = vmul.f32 0.5, %v4989_v33  ;;  %v4211_v52 = vpop.f32.mrb[72].mxu1 }
 0x4d9   :  { %v4993_v29 = vpop.eup %4992  ;;  %v3560_v31 = vmul.f32 0.5, %v4991_v36  ;;  %v3502_v3 = vadd.f32 %v4211_v52, %v6496_v51  ;;  %v3493_v5 = vpop.f32.mrb[73].mxu1 }
 0x4da   :  { %v4995_v37 = vpop.eup %4994  ;;  %v3563_v38 = vmul.f32 0.5, %v4993_v29  ;;  %v3494_v39 = vadd.f32 %v6496_v51, %v3493_v5  ;;  %v4212_v40 = vpop.f32.mrb[74].mxu1  ;;  %v3578_v19 = vadd.f32 0.5, %v3562_v50  ;;  %v4080_v50 = vld [vmem:[%s6599_s10] ss:$0 sm:$0xff] }
 0x4db   :  { %v3561_v16 = vmul.f32 0.5, %v4995_v37  ;;  %v3534_v41 = vmul.f32 0.5, %v3502_v3  ;;  %v3505_v42 = vadd.f32 %v4212_v40, %v6496_v51  ;;  %v3496_v15 = vpop.f32.mrb[75].mxu1  ;;  %v3576_v46 = vadd.f32 0.5, %v3560_v31 }
 0x4dc   :  { %v3579_v43 = vadd.f32 0.5, %v3563_v38  ;;  %v3532_v44 = vmul.f32 0.5, %v3494_v39  ;;  %v3497_v45 = vadd.f32 %v6496_v51, %v3496_v15 }
 0x4dd   :  { %v3577_v47 = vadd.f32 0.5, %v3561_v16  ;;  %4996 = vtanh.f32 %v3534_v41  ;;  %v3535_v48 = vmul.f32 0.5, %v3505_v42 }
 0x4de   :  { %v3591_v34 = vpack.c.bf16 %v3579_v43, %v3578_v19  ;;  %4998 = vtanh.f32 %v3532_v44  ;;  %v3533_v49 = vmul.f32 0.5, %v3497_v45 }
 0x4df   :  { %v3590_v54 = vpack.c.bf16 %v3577_v47, %v3576_v46  ;;  %5000 = vtanh.f32 %v3535_v48 }
 0x4e0   :  { %5002 = vtanh.f32 %v3533_v49 }
 0x4e1   :  { %4229 = vmatprep.mubr.msk.bf16.mxu1 %vm3635_vm1, %v3590_v54 }
 0x4e2   :  { %4230 = vmatmul.mubr.msk.bf16.gmra.mrb[84].mxu1 %vm3635_vm1, %v3591_v34 }
 0x4e7   :  { %v4997_v55 = vpop.eup %4996 }
 0x4e8   :  { %v4999_v56 = vpop.eup %4998  ;;  %v3566_v58 = vmul.f32 0.5, %v4997_v55  ;;  %v4215_v59 = vpop.f32.mrb[76].mxu1 }
 0x4e9   :  { %v5001_v60 = vpop.eup %5000  ;;  %v3564_v61 = vmul.f32 0.5, %v4999_v56  ;;  %v3518_v62 = vadd.f32 %v4215_v59, %v6496_v51  ;;  %v3509_v63 = vpop.f32.mrb[77].mxu1 }
 0x4ea   :  { %v5003_v0 = vpop.eup %5002  ;;  %v3567_v1 = vmul.f32 0.5, %v5001_v60  ;;  %v3510_v2 = vadd.f32 %v6496_v51, %v3509_v63  ;;  %v4216_v4 = vpop.f32.mrb[78].mxu1  ;;  %v3582_v12 = vadd.f32 0.5, %v3566_v58 }
 0x4eb   :  { %v3565_v7 = vmul.f32 0.5, %v5003_v0  ;;  %v3538_v9 = vmul.f32 0.5, %v3518_v62  ;;  %v3521_v10 = vadd.f32 %v4216_v4, %v6496_v51  ;;  %v3512_v11 = vpop.f32.mrb[79].mxu1  ;;  %v3580_v18 = vadd.f32 0.5, %v3564_v61 }
 0x4ec   :  { %v3583_v13 = vadd.f32 0.5, %v3567_v1  ;;  %v3536_v14 = vmul.f32 0.5, %v3510_v2  ;;  %v3513_v17 = vadd.f32 %v6496_v51, %v3512_v11 }
 0x4ed   :  { %v3581_v20 = vadd.f32 0.5, %v3565_v7  ;;  %5004 = vtanh.f32 %v3538_v9  ;;  %v3539_v21 = vmul.f32 0.5, %v3521_v10 }
 0x4ee   :  { %v3593_v22 = vpack.c.bf16 %v3583_v13, %v3582_v12  ;;  %5006 = vtanh.f32 %v3536_v14  ;;  %v3537_v25 = vmul.f32 0.5, %v3513_v17 }
 0x4ef   :  { %v3592_v26 = vpack.c.bf16 %v3581_v20, %v3580_v18  ;;  %5008 = vtanh.f32 %v3539_v21 }
 0x4f0   :  { %5010 = vtanh.f32 %v3537_v25 }
 0x4f1   :  { %4233 = vmatprep.mubr.msk.bf16.mxu1 %vm3635_vm1, %v3592_v26 }
 0x4f2   :  { %4234 = vmatmul.mubr.msk.bf16.gmra.mrb[88].mxu1 %vm3635_vm1, %v3593_v22 }
 0x4f7   :  { %v5005_v23 = vpop.eup %5004 }
 0x4f8   :  { %v5007_v27 = vpop.eup %5006  ;;  %v3570_v24 = vmul.f32 0.5, %v5005_v23 }
 0x4f9   :  { %v5009_v6 = vpop.eup %5008  ;;  %v3568_v8 = vmul.f32 0.5, %v5007_v27 }
 0x4fa   :  { %v5011_v51 = vpop.eup %5010  ;;  %v3571_v28 = vmul.f32 0.5, %v5009_v6  ;;  %v3586_v32 = vadd.f32 0.5, %v3570_v24 }
 0x4fb   :  { %v3569_v30 = vmul.f32 0.5, %v5011_v51  ;;  %v3584_v53 = vadd.f32 0.5, %v3568_v8 }
 0x4fc   :  { %v3587_v35 = vadd.f32 0.5, %v3571_v28 }
 0x4fd   :  { %v3585_v57 = vadd.f32 0.5, %v3569_v30 }
 0x4fe   :  { %v3595_v33 = vpack.c.bf16 %v3587_v35, %v3586_v32 }
 0x4ff   :  { %v3594_v36 = vpack.c.bf16 %v3585_v57, %v3584_v53 }
 0x501   :  { %4237 = vmatprep.mubr.msk.bf16.mxu1 %vm3635_vm1, %v3594_v36 }
 0x502   :  { %4238 = vmatmul.mubr.msk.bf16.gmra.mrb[92].mxu1 %vm3635_vm1, %v3595_v33 }
 0x5a5   :  { %v4227_v52 = vpop.f32.mrb[80].mxu1 }
 0x5a6   :  { %v3703_v29 = vadd.f32 %v4227_v52, %v4080_v50  ;;  %v3694_v31 = vpop.f32.mrb[81].mxu1 }
 0x5a7   :  { %v3695_v3 = vadd.f32 %v4080_v50, %v3694_v31  ;;  %v4228_v5 = vpop.f32.mrb[82].mxu1 }
 0x5a8   :  { %3760 = vst.msk [vmem:[%s6600_s11 + $0x10] sm:$0xff] %vm3757_vm2, %v3703_v29  ;;  %v3706_v37 = vadd.f32 %v4228_v5, %v4080_v50  ;;  %v3697_v38 = vpop.f32.mrb[83].mxu1 }
 0x5a9   :  { %3758 = vst.msk [vmem:[%s6600_s11] sm:$0xff] %vm3757_vm2, %v3695_v3  ;;  %v3698_v39 = vadd.f32 %v4080_v50, %v3697_v38 }
 0x5aa   :  { %3761 = vst.msk [vmem:[%s6600_s11 + $0x18] sm:$0xff] %vm3757_vm2, %v3706_v37 }
 0x5ab   :  { %3759 = vst.msk [vmem:[%s6600_s11 + $0x8] sm:$0xff] %vm3757_vm2, %v3698_v39 }
 0x5b5   :  { %v4231_v40 = vpop.f32.mrb[84].mxu1 }
 0x5b6   :  { %v3719_v16 = vadd.f32 %v4231_v40, %v4080_v50  ;;  %v3710_v41 = vpop.f32.mrb[85].mxu1 }
 0x5b7   :  { %v3711_v42 = vadd.f32 %v4080_v50, %v3710_v41  ;;  %v4232_v15 = vpop.f32.mrb[86].mxu1 }
 0x5b8   :  { %3764 = vst.msk [vmem:[%s6600_s11 + $0x30] sm:$0xff] %vm3757_vm2, %v3719_v16  ;;  %v3722_v19 = vadd.f32 %v4232_v15, %v4080_v50  ;;  %v3713_v43 = vpop.f32.mrb[87].mxu1 }
 0x5b9   :  { %3762 = vst.msk [vmem:[%s6600_s11 + $0x20] sm:$0xff] %vm3757_vm2, %v3711_v42  ;;  %v3714_v44 = vadd.f32 %v4080_v50, %v3713_v43 }
 0x5ba   :  { %3765 = vst.msk [vmem:[%s6600_s11 + $0x38] sm:$0xff] %vm3757_vm2, %v3722_v19 }
 0x5bb   :  { %3763 = vst.msk [vmem:[%s6600_s11 + $0x28] sm:$0xff] %vm3757_vm2, %v3714_v44 }
 0x5c5   :  { %v4235_v45 = vpop.f32.mrb[88].mxu1 }
 0x5c6   :  { %v3735_v46 = vadd.f32 %v4235_v45, %v4080_v50  ;;  %v3726_v47 = vpop.f32.mrb[89].mxu1 }
 0x5c7   :  { %v3727_v48 = vadd.f32 %v4080_v50, %v3726_v47  ;;  %v4236_v34 = vpop.f32.mrb[90].mxu1 }
 0x5c8   :  { %3768 = vst.msk [vmem:[%s6600_s11 + $0x50] sm:$0xff] %vm3757_vm2, %v3735_v46  ;;  %v3738_v49 = vadd.f32 %v4236_v34, %v4080_v50  ;;  %v3729_v54 = vpop.f32.mrb[91].mxu1 }
 0x5c9   :  { %3766 = vst.msk [vmem:[%s6600_s11 + $0x40] sm:$0xff] %vm3757_vm2, %v3727_v48  ;;  %v3730_v55 = vadd.f32 %v4080_v50, %v3729_v54 }
 0x5ca   :  { %3769 = vst.msk [vmem:[%s6600_s11 + $0x58] sm:$0xff] %vm3757_vm2, %v3738_v49 }
 0x5cb   :  { %3767 = vst.msk [vmem:[%s6600_s11 + $0x48] sm:$0xff] %vm3757_vm2, %v3730_v55 }
 0x5d5   :  { %v4239_v56 = vpop.f32.mrb[92].mxu1 }
 0x5d6   :  { %v3751_v58 = vadd.f32 %v4239_v56, %v4080_v50  ;;  %v3742_v59 = vpop.f32.mrb[93].mxu1 }
 0x5d7   :  { %v3743_v60 = vadd.f32 %v4080_v50, %v3742_v59  ;;  %v4240_v61 = vpop.f32.mrb[94].mxu1 }
 0x5d8   :  { %3772 = vst.msk [vmem:[%s6600_s11 + $0x70] sm:$0xff] %vm3757_vm2, %v3751_v58  ;;  %v3754_v62 = vadd.f32 %v4240_v61, %v4080_v50  ;;  %v3745_v63 = vpop.f32.mrb[95].mxu1 }
 0x5d9   :  { %3770 = vst.msk [vmem:[%s6600_s11 + $0x60] sm:$0xff] %vm3757_vm2, %v3743_v60  ;;  %v3746_v0 = vadd.f32 %v4080_v50, %v3745_v63 }
 0x5da   :  { %3773 = vst.msk [vmem:[%s6600_s11 + $0x78] sm:$0xff] %vm3757_vm2, %v3754_v62 }
 0x5db   :  { %3771 = vst.msk [vmem:[%s6600_s11 + $0x68] sm:$0xff] %vm3757_vm2, %v3746_v0 }

</bundles_post_ra>
